<compile_context>
chip_gen: v7x
topology: tpu7x:2x2x1
jax: 0.10.0
libtpu: 0.0.40
codegen_flags: <defaults>
</compile_context>

<pallas_src>
import functools

import jax
import jax.numpy as jnp
from jax.experimental import pallas as pl
from jax.experimental.pallas import tpu as pltpu


# ----------------------------------------------------------------------------
# Pallas kernel: in-VMEM im2col + fused 4-gate bf16 matmul + ConvLSTM update
# ----------------------------------------------------------------------------
def _convlstm_kernel(xh_ref, c_ref, pw_ref, w_ref, b_ref, ch_ref, cc_ref,
                     patch_ref, *, k, wp, n_pix, hidden, c_pad):
    """One grid step = `batch_tile` images.

    xh_ref : (bt, c_pad, lpad)   bf16  x||h, spatially zero-padded, flattened,
                                       plus p*(wp+1) zero lanes on both ends
    c_ref  : (bt, hidden, n_pix) f32   cell state (padded coords)
    pw_ref : (3, hidden, n_pix)  f32   peephole Wci / Wcf / Wco (padded coords)
    w_ref  : (4*hidden, k*k*c_pad) bf16 gate weights, cols = (tap, in_channel)
    b_ref  : (4*hidden, 1)       f32   gate bias, gate order (i, f, c, o)
    ch/cc  : (bt, hidden, n_pix) f32   outputs (padded coords, cropped outside)
    patch_ref : VMEM (k*k*c_pad, n_pix) bf16 scratch (in-VMEM im2col)
    """
    w = w_ref[...]                      # (4*hidden, k*k*c_pad) bf16, loaded once
    bias = b_ref[...]                   # (4*hidden, 1) f32
    wci = pw_ref[0]                     # (hidden, n_pix) f32
    wcf = pw_ref[1]
    wco = pw_ref[2]

    bt = xh_ref.shape[0]
    for bi in range(bt):                # static, unrolled
        # In-VMEM im2col: conv tap (dy, dx) is a pure lane shift of dy*wp + dx
        # in padded coordinates.  Rows are written at bf16-aligned offsets.
        for t in range(k * k):
            dy, dx = t // k, t % k
            off = dy * wp + dx
            patch_ref[t * c_pad:(t + 1) * c_pad, :] = \
                xh_ref[bi, :, off:off + n_pix]

        # All four gates of both convs in one bf16 MXU matmul, f32 accumulate.
        gates = jnp.dot(w, patch_ref[...],
                        preferred_element_type=jnp.float32) + bias

        c = c_ref[bi]                                   # (hidden, n_pix) f32
        xi = gates[0 * hidden:1 * hidden]
        xf = gates[1 * hidden:2 * hidden]
        xg = gates[2 * hidden:3 * hidden]
        xo = gates[3 * hidden:4 * hidden]

        ci = jax.nn.sigmoid(xi + c * wci)
        cf = jax.nn.sigmoid(xf + c * wcf)
        cc = cf * c + ci * jnp.tanh(xg)
        co = jax.nn.sigmoid(xo + cc * wco)
        ch_ref[bi] = (co * jnp.tanh(cc)).astype(ch_ref.dtype)
        cc_ref[bi] = cc.astype(cc_ref.dtype)


# ----------------------------------------------------------------------------
# Wrapper: layout packing (all cheap pads/reshapes, no HBM im2col) + pallas_call
# ----------------------------------------------------------------------------
@functools.partial(jax.jit, static_argnames=("kernel_size", "batch_tile"))
def convlstm_cell_forward(x, h, c, params, kernel_size, batch_tile=1):
    """Exact ConvLSTMCell.forward semantics.  x/h/c NCHW; returns (ch, (ch, cc))."""
    B, Cin, H, W = x.shape
    Ch = h.shape[1]
    k = kernel_size
    p = (k - 1) // 2
    Hp, Wp = H + 2 * p, W + 2 * p
    n_pix = Hp * Wp                         # gates computed at padded coords
    edge = p * (Wp + 1)                     # zero lanes so every tap shift is in-bounds
    lpad = n_pix + 2 * edge
    c_pad = ((Cin + Ch + 15) // 16) * 16    # bf16 sublane-packing friendly
    assert B % batch_tile == 0
    bt = batch_tile

    # ---- x || h: pad channels + spatial ring, flatten, edge-pad lanes, bf16.
    xh = jnp.concatenate([x, h], axis=1)                              # (B, Cin+Ch, H, W)
    xh = jnp.pad(xh, ((0, 0), (0, c_pad - (Cin + Ch)), (p, p), (p, p)))
    xh = xh.reshape(B, c_pad, n_pix)
    xh = jnp.pad(xh, ((0, 0), (0, 0), (edge, edge))).astype(jnp.bfloat16)

    # ---- cell state / peepholes in padded coords (channel-major, no transposes).
    c_p = jnp.pad(c, ((0, 0), (0, 0), (p, p), (p, p))).reshape(B, Ch, n_pix)
    pw = jnp.concatenate([params["Wci"], params["Wcf"], params["Wco"]], axis=0)
    pw = jnp.pad(pw, ((0, 0), (0, 0), (p, p), (p, p))).reshape(3, Ch, n_pix)
    pw = pw.astype(jnp.float32)

    # ---- gate weights: rows = (i,f,c,o) x out_ch, cols = (tap, padded in_ch).
    def pack(wx, wh):
        wcat = jnp.concatenate([wx, wh], axis=1)                      # (Ch, Cin+Ch, k, k)
        wcat = jnp.pad(wcat, ((0, 0), (0, c_pad - (Cin + Ch)), (0, 0), (0, 0)))
        wcat = wcat.reshape(Ch, c_pad, k * k).transpose(0, 2, 1)      # (Ch, k*k, c_pad)
        return wcat.reshape(Ch, k * k * c_pad)

    w = jnp.concatenate([
        pack(params["Wxi_w"], params["Whi_w"]),
        pack(params["Wxf_w"], params["Whf_w"]),
        pack(params["Wxc_w"], params["Whc_w"]),
        pack(params["Wxo_w"], params["Who_w"]),
    ], axis=0).astype(jnp.bfloat16)                                   # (4*Ch, k*k*c_pad)
    bias = jnp.concatenate([params["Wxi_b"], params["Wxf_b"],
                            params["Wxc_b"], params["Wxo_b"]]
                           ).reshape(4 * Ch, 1).astype(jnp.float32)

    kern = functools.partial(_convlstm_kernel, k=k, wp=Wp, n_pix=n_pix,
                             hidden=Ch, c_pad=c_pad)

    ch_p, cc_p = pl.pallas_call(
        kern,
        out_shape=(jax.ShapeDtypeStruct((B, Ch, n_pix), x.dtype),
                   jax.ShapeDtypeStruct((B, Ch, n_pix), x.dtype)),
        grid_spec=pltpu.PrefetchScalarGridSpec(
            num_scalar_prefetch=0,
            grid=(B // bt,),
            in_specs=[
                pl.BlockSpec((bt, c_pad, lpad), lambda i: (i, 0, 0)),     # x||h
                pl.BlockSpec((bt, Ch, n_pix), lambda i: (i, 0, 0)),       # c
                pl.BlockSpec((3, Ch, n_pix), lambda i: (0, 0, 0)),        # peepholes (1 copy)
                pl.BlockSpec((4 * Ch, k * k * c_pad), lambda i: (0, 0)),  # gate weights
                pl.BlockSpec((4 * Ch, 1), lambda i: (0, 0)),              # bias
            ],
            out_specs=[
                pl.BlockSpec((bt, Ch, n_pix), lambda i: (i, 0, 0)),       # ch
                pl.BlockSpec((bt, Ch, n_pix), lambda i: (i, 0, 0)),       # cc
            ],
            scratch_shapes=[pltpu.VMEM((k * k * c_pad, n_pix), jnp.bfloat16)],
        ),
        compiler_params=pltpu.CompilerParams(
            dimension_semantics=("parallel",)),
    )(xh, c_p, pw, w, bias)

    # Crop the junk border pixels; reshape back to NCHW is free (channel-major).
    ch_out = ch_p.reshape(B, Ch, Hp, Wp)[:, :, p:p + H, p:p + W]
    cc_out = cc_p.reshape(B, Ch, Hp, Wp)[:, :, p:p + H, p:p + W]
    return ch_out, (ch_out, cc_out)


# ----------------------------------------------------------------------------
# Pure-JAX reference (lax.conv, full f32) for correctness checking
# ----------------------------------------------------------------------------
def reference_forward(x, h, c, params, kernel_size):
    pad = (kernel_size - 1) // 2

    def conv(inp, w, b=None):
        out = jax.lax.conv_general_dilated(
            inp, w, window_strides=(1, 1), padding=[(pad, pad), (pad, pad)],
            dimension_numbers=("NCHW", "OIHW", "NCHW"))
        if b is not None:
            out = out + b[None, :, None, None]
        return out

    p = params
    ci = jax.nn.sigmoid(conv(x, p["Wxi_w"], p["Wxi_b"]) + conv(h, p["Whi_w"]) + c * p["Wci"])
    cf = jax.nn.sigmoid(conv(x, p["Wxf_w"], p["Wxf_b"]) + conv(h, p["Whf_w"]) + c * p["Wcf"])
    cc = cf * c + ci * jnp.tanh(conv(x, p["Wxc_w"], p["Wxc_b"]) + conv(h, p["Whc_w"]))
    co = jax.nn.sigmoid(conv(x, p["Wxo_w"], p["Wxo_b"]) + conv(h, p["Who_w"]) + cc * p["Wco"])
    ch = co * jnp.tanh(cc)
    return ch, (ch, cc)


# ----------------------------------------------------------------------------
if __name__ == "__main__":
    B, Cin, Ch, H, W, K = 2, 4, 32, 16, 16, 3   # Ch even, as the module asserts

    key = jax.random.PRNGKey(0)
    ks = jax.random.split(key, 18)
    dt = jnp.float32

    def winit(k_, shape, fan_in):
        bound = 1.0 / jnp.sqrt(fan_in)
        return jax.random.uniform(k_, shape, dt, -bound, bound)

    fan_x = Cin * K * K
    fan_h = Ch * K * K
    params = {
        "Wxi_w": winit(ks[0], (Ch, Cin, K, K), fan_x), "Wxi_b": winit(ks[1], (Ch,), fan_x),
        "Wxf_w": winit(ks[2], (Ch, Cin, K, K), fan_x), "Wxf_b": winit(ks[3], (Ch,), fan_x),
        "Wxc_w": winit(ks[4], (Ch, Cin, K, K), fan_x), "Wxc_b": winit(ks[5], (Ch,), fan_x),
        "Wxo_w": winit(ks[6], (Ch, Cin, K, K), fan_x), "Wxo_b": winit(ks[7], (Ch,), fan_x),
        "Whi_w": winit(ks[8], (Ch, Ch, K, K), fan_h),
        "Whf_w": winit(ks[9], (Ch, Ch, K, K), fan_h),
        "Whc_w": winit(ks[10], (Ch, Ch, K, K), fan_h),
        "Who_w": winit(ks[11], (Ch, Ch, K, K), fan_h),
        # Peephole weights are zero right after initial_state(); use small
        # random values here so the peephole path is actually exercised.
        "Wci": 0.1 * jax.random.normal(ks[15], (1, Ch, H, W), dt),
        "Wcf": 0.1 * jax.random.normal(ks[16], (1, Ch, H, W), dt),
        "Wco": 0.1 * jax.random.normal(ks[17], (1, Ch, H, W), dt),
    }

    x = jax.random.normal(ks[12], (B, Cin, H, W), dt)
    h = jax.random.normal(ks[13], (B, Ch, H, W), dt)
    c = jax.random.normal(ks[14], (B, Ch, H, W), dt)

    ch, (ch2, cc) = convlstm_cell_forward(x, h, c, params, kernel_size=K)
    jax.block_until_ready((ch, cc))

    ch_ref, (_, cc_ref) = reference_forward(x, h, c, params, K)
    # bf16 matmul inputs + f32 accumulate -> relaxed tolerance vs pure-f32 ref.
    assert jnp.allclose(ch, ch_ref, atol=3e-2, rtol=3e-2), "ch mismatch"
    assert jnp.allclose(cc, cc_ref, atol=3e-2, rtol=3e-2), "cc mismatch"

    print("KERNEL_OK")
</pallas_src>

<mosaic_0001>
module attributes {stable_mosaic.version = 11 : i64} {
  func.func @_convlstm_kernel(%arg0: i32, %arg1: memref<1x48x362xbf16, #tpu.memory_space<vmem>>, %arg2: memref<1x32x324xf32, #tpu.memory_space<vmem>>, %arg3: memref<3x32x324xf32, #tpu.memory_space<vmem>>, %arg4: memref<128x432xbf16, #tpu.memory_space<vmem>>, %arg5: memref<128x1xf32, #tpu.memory_space<vmem>>, %arg6: memref<1x32x324xf32, #tpu.memory_space<vmem>>, %arg7: memref<1x32x324xf32, #tpu.memory_space<vmem>>, %arg8: memref<432x324xbf16, #tpu.memory_space<vmem>>) attributes {dimension_semantics = [#tpu.dimension_semantics<parallel>], iteration_bounds = array<i64: 2>, scalar_prefetch = 0 : i64, scratch_operands = 1 : i64, tpu.core_type = #tpu.core_type<tc>, window_params = [{transform_indices = @transform_0, window_bounds = array<i64: 1, 48, 362>}, {transform_indices = @transform_1, window_bounds = array<i64: 1, 32, 324>}, {pipeline_mode = #tpu.pipeline_mode<synchronous>, transform_indices = @transform_2, window_bounds = array<i64: 3, 32, 324>}, {pipeline_mode = #tpu.pipeline_mode<synchronous>, transform_indices = @transform_3, window_bounds = array<i64: 128, 432>}, {pipeline_mode = #tpu.pipeline_mode<synchronous>, transform_indices = @transform_4, window_bounds = array<i64: 128, 1>}, {transform_indices = @transform_5, window_bounds = array<i64: 1, 32, 324>}, {transform_indices = @transform_6, window_bounds = array<i64: 1, 32, 324>}]} {
    %c0 = arith.constant 0 : index
    %c0_0 = arith.constant 0 : index
    %0 = vector.load %arg4[%c0, %c0_0] : memref<128x432xbf16, #tpu.memory_space<vmem>>, vector<128x432xbf16>
    %c0_1 = arith.constant 0 : index
    %c0_2 = arith.constant 0 : index
    %1 = vector.load %arg5[%c0_1, %c0_2] : memref<128x1xf32, #tpu.memory_space<vmem>>, vector<128x1xf32>
    %c0_3 = arith.constant 0 : index
    %c0_4 = arith.constant 0 : index
    %c0_5 = arith.constant 0 : index
    %2 = vector.load %arg3[%c0_3, %c0_4, %c0_5] : memref<3x32x324xf32, #tpu.memory_space<vmem>>, vector<1x32x324xf32>
    %3 = vector.shape_cast %2 : vector<1x32x324xf32> to vector<32x324xf32>
    %c1 = arith.constant 1 : index
    %c0_6 = arith.constant 0 : index
    %c0_7 = arith.constant 0 : index
    %4 = vector.load %arg3[%c1, %c0_6, %c0_7] : memref<3x32x324xf32, #tpu.memory_space<vmem>>, vector<1x32x324xf32>
    %5 = vector.shape_cast %4 : vector<1x32x324xf32> to vector<32x324xf32>
    %c2 = arith.constant 2 : index
    %c0_8 = arith.constant 0 : index
    %c0_9 = arith.constant 0 : index
    %6 = vector.load %arg3[%c2, %c0_8, %c0_9] : memref<3x32x324xf32, #tpu.memory_space<vmem>>, vector<1x32x324xf32>
    %7 = vector.shape_cast %6 : vector<1x32x324xf32> to vector<32x324xf32>
    %c0_10 = arith.constant 0 : index
    %c0_11 = arith.constant 0 : index
    %c0_12 = arith.constant 0 : index
    %8 = vector.load %arg1[%c0_10, %c0_11, %c0_12] : memref<1x48x362xbf16, #tpu.memory_space<vmem>>, vector<1x48x324xbf16>
    %9 = vector.shape_cast %8 : vector<1x48x324xbf16> to vector<48x324xbf16>
    %c0_13 = arith.constant 0 : index
    %c0_14 = arith.constant 0 : index
    %10 = vector.load %arg8[%c0_13, %c0_14] : memref<432x324xbf16, #tpu.memory_space<vmem>>, vector<48x324xbf16>
    tpu.vector_store %arg8[%c0_13, %c0_14], %9 {strides = array<i32>} : memref<432x324xbf16, #tpu.memory_space<vmem>>, vector<48x324xbf16>,
    %c0_15 = arith.constant 0 : index
    %c0_16 = arith.constant 0 : index
    %c1_17 = arith.constant 1 : index
    %11 = vector.load %arg1[%c0_15, %c0_16, %c1_17] : memref<1x48x362xbf16, #tpu.memory_space<vmem>>, vector<1x48x324xbf16>
    %12 = vector.shape_cast %11 : vector<1x48x324xbf16> to vector<48x324xbf16>
    %c48 = arith.constant 48 : index
    %c0_18 = arith.constant 0 : index
    %13 = vector.load %arg8[%c48, %c0_18] : memref<432x324xbf16, #tpu.memory_space<vmem>>, vector<48x324xbf16>
    tpu.vector_store %arg8[%c48, %c0_18], %12 {strides = array<i32>} : memref<432x324xbf16, #tpu.memory_space<vmem>>, vector<48x324xbf16>,
    %c0_19 = arith.constant 0 : index
    %c0_20 = arith.constant 0 : index
    %c2_21 = arith.constant 2 : index
    %14 = vector.load %arg1[%c0_19, %c0_20, %c2_21] : memref<1x48x362xbf16, #tpu.memory_space<vmem>>, vector<1x48x324xbf16>
    %15 = vector.shape_cast %14 : vector<1x48x324xbf16> to vector<48x324xbf16>
    %c96 = arith.constant 96 : index
    %c0_22 = arith.constant 0 : index
    %16 = vector.load %arg8[%c96, %c0_22] : memref<432x324xbf16, #tpu.memory_space<vmem>>, vector<48x324xbf16>
    tpu.vector_store %arg8[%c96, %c0_22], %15 {strides = array<i32>} : memref<432x324xbf16, #tpu.memory_space<vmem>>, vector<48x324xbf16>,
    %c0_23 = arith.constant 0 : index
    %c0_24 = arith.constant 0 : index
    %c18 = arith.constant 18 : index
    %17 = vector.load %arg1[%c0_23, %c0_24, %c18] : memref<1x48x362xbf16, #tpu.memory_space<vmem>>, vector<1x48x324xbf16>
    %18 = vector.shape_cast %17 : vector<1x48x324xbf16> to vector<48x324xbf16>
    %c144 = arith.constant 144 : index
    %c0_25 = arith.constant 0 : index
    %19 = vector.load %arg8[%c144, %c0_25] : memref<432x324xbf16, #tpu.memory_space<vmem>>, vector<48x324xbf16>
    tpu.vector_store %arg8[%c144, %c0_25], %18 {strides = array<i32>} : memref<432x324xbf16, #tpu.memory_space<vmem>>, vector<48x324xbf16>,
    %c0_26 = arith.constant 0 : index
    %c0_27 = arith.constant 0 : index
    %c19 = arith.constant 19 : index
    %20 = vector.load %arg1[%c0_26, %c0_27, %c19] : memref<1x48x362xbf16, #tpu.memory_space<vmem>>, vector<1x48x324xbf16>
    %21 = vector.shape_cast %20 : vector<1x48x324xbf16> to vector<48x324xbf16>
    %c192 = arith.constant 192 : index
    %c0_28 = arith.constant 0 : index
    %22 = vector.load %arg8[%c192, %c0_28] : memref<432x324xbf16, #tpu.memory_space<vmem>>, vector<48x324xbf16>
    tpu.vector_store %arg8[%c192, %c0_28], %21 {strides = array<i32>} : memref<432x324xbf16, #tpu.memory_space<vmem>>, vector<48x324xbf16>,
    %c0_29 = arith.constant 0 : index
    %c0_30 = arith.constant 0 : index
    %c20 = arith.constant 20 : index
    %23 = vector.load %arg1[%c0_29, %c0_30, %c20] : memref<1x48x362xbf16, #tpu.memory_space<vmem>>, vector<1x48x324xbf16>
    %24 = vector.shape_cast %23 : vector<1x48x324xbf16> to vector<48x324xbf16>
    %c240 = arith.constant 240 : index
    %c0_31 = arith.constant 0 : index
    %25 = vector.load %arg8[%c240, %c0_31] : memref<432x324xbf16, #tpu.memory_space<vmem>>, vector<48x324xbf16>
    tpu.vector_store %arg8[%c240, %c0_31], %24 {strides = array<i32>} : memref<432x324xbf16, #tpu.memory_space<vmem>>, vector<48x324xbf16>,
    %c0_32 = arith.constant 0 : index
    %c0_33 = arith.constant 0 : index
    %c36 = arith.constant 36 : index
    %26 = vector.load %arg1[%c0_32, %c0_33, %c36] : memref<1x48x362xbf16, #tpu.memory_space<vmem>>, vector<1x48x324xbf16>
    %27 = vector.shape_cast %26 : vector<1x48x324xbf16> to vector<48x324xbf16>
    %c288 = arith.constant 288 : index
    %c0_34 = arith.constant 0 : index
    %28 = vector.load %arg8[%c288, %c0_34] : memref<432x324xbf16, #tpu.memory_space<vmem>>, vector<48x324xbf16>
    tpu.vector_store %arg8[%c288, %c0_34], %27 {strides = array<i32>} : memref<432x324xbf16, #tpu.memory_space<vmem>>, vector<48x324xbf16>,
    %c0_35 = arith.constant 0 : index
    %c0_36 = arith.constant 0 : index
    %c37 = arith.constant 37 : index
    %29 = vector.load %arg1[%c0_35, %c0_36, %c37] : memref<1x48x362xbf16, #tpu.memory_space<vmem>>, vector<1x48x324xbf16>
    %30 = vector.shape_cast %29 : vector<1x48x324xbf16> to vector<48x324xbf16>
    %c336 = arith.constant 336 : index
    %c0_37 = arith.constant 0 : index
    %31 = vector.load %arg8[%c336, %c0_37] : memref<432x324xbf16, #tpu.memory_space<vmem>>, vector<48x324xbf16>
    tpu.vector_store %arg8[%c336, %c0_37], %30 {strides = array<i32>} : memref<432x324xbf16, #tpu.memory_space<vmem>>, vector<48x324xbf16>,
    %c0_38 = arith.constant 0 : index
    %c0_39 = arith.constant 0 : index
    %c38 = arith.constant 38 : index
    %32 = vector.load %arg1[%c0_38, %c0_39, %c38] : memref<1x48x362xbf16, #tpu.memory_space<vmem>>, vector<1x48x324xbf16>
    %33 = vector.shape_cast %32 : vector<1x48x324xbf16> to vector<48x324xbf16>
    %c384 = arith.constant 384 : index
    %c0_40 = arith.constant 0 : index
    %34 = vector.load %arg8[%c384, %c0_40] : memref<432x324xbf16, #tpu.memory_space<vmem>>, vector<48x324xbf16>
    tpu.vector_store %arg8[%c384, %c0_40], %33 {strides = array<i32>} : memref<432x324xbf16, #tpu.memory_space<vmem>>, vector<48x324xbf16>,
    %c0_41 = arith.constant 0 : index
    %c0_42 = arith.constant 0 : index
    %35 = vector.load %arg8[%c0_41, %c0_42] : memref<432x324xbf16, #tpu.memory_space<vmem>>, vector<432x324xbf16>
    %cst = arith.constant dense<0.000000e+00> : vector<128x324xf32>
    %36 = tpu.matmul %0, %35, %cst {dimension_numbers = #tpu.dot_dimension_numbers<[1], [0], [0], [1], [0, 0, 1, 1], [], []>} : vector<128x432xbf16>, vector<432x324xbf16>, vector<128x324xf32> -> vector<128x324xf32>
    %37 = vector.broadcast %1 : vector<128x1xf32> to vector<128x324xf32>
    %38 = arith.addf %36, %37 : vector<128x324xf32>
    %c0_43 = arith.constant 0 : index
    %c0_44 = arith.constant 0 : index
    %c0_45 = arith.constant 0 : index
    %39 = vector.load %arg2[%c0_43, %c0_44, %c0_45] : memref<1x32x324xf32, #tpu.memory_space<vmem>>, vector<1x32x324xf32>
    %40 = vector.shape_cast %39 : vector<1x32x324xf32> to vector<32x324xf32>
    %41 = vector.extract_strided_slice %38 {offsets = [0, 0], sizes = [32, 324], strides = [1, 1]} : vector<128x324xf32> to vector<32x324xf32>
    %42 = vector.extract_strided_slice %38 {offsets = [32, 0], sizes = [32, 324], strides = [1, 1]} : vector<128x324xf32> to vector<32x324xf32>
    %43 = vector.extract_strided_slice %38 {offsets = [64, 0], sizes = [32, 324], strides = [1, 1]} : vector<128x324xf32> to vector<32x324xf32>
    %44 = vector.extract_strided_slice %38 {offsets = [96, 0], sizes = [32, 324], strides = [1, 1]} : vector<128x324xf32> to vector<32x324xf32>
    %45 = arith.mulf %40, %3 : vector<32x324xf32>
    %46 = arith.addf %41, %45 : vector<32x324xf32>
    %47 = arith.negf %46 : vector<32x324xf32>
    %48 = math.exp %47 : vector<32x324xf32>
    %cst_46 = arith.constant 1.000000e+00 : f32
    %49 = vector.broadcast %cst_46 : f32 to vector<32x324xf32>
    %50 = arith.addf %49, %48 : vector<32x324xf32>
    %51 = arith.divf %49, %50 : vector<32x324xf32>
    %52 = arith.mulf %40, %5 : vector<32x324xf32>
    %53 = arith.addf %42, %52 : vector<32x324xf32>
    %54 = arith.negf %53 : vector<32x324xf32>
    %55 = math.exp %54 : vector<32x324xf32>
    %cst_47 = arith.constant 1.000000e+00 : f32
    %56 = vector.broadcast %cst_47 : f32 to vector<32x324xf32>
    %57 = arith.addf %56, %55 : vector<32x324xf32>
    %58 = arith.divf %56, %57 : vector<32x324xf32>
    %59 = arith.mulf %58, %40 : vector<32x324xf32>
    %60 = math.tanh %43 : vector<32x324xf32>
    %61 = arith.mulf %51, %60 : vector<32x324xf32>
    %62 = arith.addf %59, %61 : vector<32x324xf32>
    %63 = arith.mulf %62, %7 : vector<32x324xf32>
    %64 = arith.addf %44, %63 : vector<32x324xf32>
    %65 = arith.negf %64 : vector<32x324xf32>
    %66 = math.exp %65 : vector<32x324xf32>
    %cst_48 = arith.constant 1.000000e+00 : f32
    %67 = vector.broadcast %cst_48 : f32 to vector<32x324xf32>
    %68 = arith.addf %67, %66 : vector<32x324xf32>
    %69 = arith.divf %67, %68 : vector<32x324xf32>
    %70 = math.tanh %62 : vector<32x324xf32>
    %71 = arith.mulf %69, %70 : vector<32x324xf32>
    %c0_49 = arith.constant 0 : index
    %c0_50 = arith.constant 0 : index
    %c0_51 = arith.constant 0 : index
    %72 = vector.load %arg6[%c0_49, %c0_50, %c0_51] : memref<1x32x324xf32, #tpu.memory_space<vmem>>, vector<1x32x324xf32>
    %73 = vector.shape_cast %72 : vector<1x32x324xf32> to vector<32x324xf32>
    %74 = vector.shape_cast %71 : vector<32x324xf32> to vector<1x32x324xf32>
    tpu.vector_store %arg6[%c0_49, %c0_50, %c0_51], %74 {strides = array<i32>} : memref<1x32x324xf32, #tpu.memory_space<vmem>>, vector<1x32x324xf32>,
    %c0_52 = arith.constant 0 : index
    %c0_53 = arith.constant 0 : index
    %c0_54 = arith.constant 0 : index
    %75 = vector.load %arg7[%c0_52, %c0_53, %c0_54] : memref<1x32x324xf32, #tpu.memory_space<vmem>>, vector<1x32x324xf32>
    %76 = vector.shape_cast %75 : vector<1x32x324xf32> to vector<32x324xf32>
    %77 = vector.shape_cast %62 : vector<32x324xf32> to vector<1x32x324xf32>
    tpu.vector_store %arg7[%c0_52, %c0_53, %c0_54], %77 {strides = array<i32>} : memref<1x32x324xf32, #tpu.memory_space<vmem>>, vector<1x32x324xf32>,
    return
  }
  func.func @transform_0(%arg0: i32) -> (i32, i32, i32) {
    %c0_i32 = arith.constant 0 : i32
    %c0_i32_0 = arith.constant 0 : i32
    %c0_i32_1 = arith.constant 0 : i32
    return %arg0, %c0_i32, %c0_i32_0 : i32, i32, i32
  }
  func.func @transform_1(%arg0: i32) -> (i32, i32, i32) {
    %c0_i32 = arith.constant 0 : i32
    %c0_i32_0 = arith.constant 0 : i32
    %c0_i32_1 = arith.constant 0 : i32
    return %arg0, %c0_i32, %c0_i32_0 : i32, i32, i32
  }
  func.func @transform_2(%arg0: i32) -> (i32, i32, i32) {
    %c0_i32 = arith.constant 0 : i32
    %c0_i32_0 = arith.constant 0 : i32
    %c0_i32_1 = arith.constant 0 : i32
    %c0_i32_2 = arith.constant 0 : i32
    return %c0_i32, %c0_i32_0, %c0_i32_1 : i32, i32, i32
  }
  func.func @transform_3(%arg0: i32) -> (i32, i32) {
    %c0_i32 = arith.constant 0 : i32
    %c0_i32_0 = arith.constant 0 : i32
    %c0_i32_1 = arith.constant 0 : i32
    return %c0_i32, %c0_i32_0 : i32, i32
  }
  func.func @transform_4(%arg0: i32) -> (i32, i32) {
    %c0_i32 = arith.constant 0 : i32
    %c0_i32_0 = arith.constant 0 : i32
    %c0_i32_1 = arith.constant 0 : i32
    return %c0_i32, %c0_i32_0 : i32, i32
  }
  func.func @transform_5(%arg0: i32) -> (i32, i32, i32) {
    %c0_i32 = arith.constant 0 : i32
    %c0_i32_0 = arith.constant 0 : i32
    %c0_i32_1 = arith.constant 0 : i32
    return %arg0, %c0_i32, %c0_i32_0 : i32, i32, i32
  }
  func.func @transform_6(%arg0: i32) -> (i32, i32, i32) {
    %c0_i32 = arith.constant 0 : i32
    %c0_i32_0 = arith.constant 0 : i32
    %c0_i32_1 = arith.constant 0 : i32
    return %arg0, %c0_i32, %c0_i32_0 : i32, i32, i32
  }
}

</mosaic_0001>

<bundles_post_ra>
// kernel: convlstm_cell_forward.1
= control target key start
LH: loop header
LB: loop body
LE: loop exit
PB: predicated region body
PF: predicated region fallthrough
CT: control target
= control target key end

     0   :  { %s3121_s21 = smov 0   ;;  %s4017_s0 = inlined_call_operand.vmem [shape: bf16[2,48,362], index: 0, kind: input, shape index: {}]   ;;  %s4018_s1 = inlined_call_operand.vmem [shape: f32[2,32,324], index: 1, kind: input, shape index: {}]   ;;  %s4019_s2 = inlined_call_operand.vmem [shape: f32[3,32,324], index: 2, kind: input, shape index: {}]   ;;  %s4020_s3 = inlined_call_operand.vmem [shape: bf16[128,432], index: 3, kind: input, shape index: {}]   ;;  %s4021_s4 = inlined_call_operand.vmem [shape: f32[128,1], index: 4, kind: input, shape index: {}]   ;;  %s4022_s5 = inlined_call_operand.vmem [shape: f32[2,32,324], index: 5, kind: output, shape index: {0}]   ;;  %s4023_s6 = inlined_call_operand.vmem [shape: f32[2,32,324], index: 6, kind: output, shape index: {1}]  }
   0x1 LB: > { %s2448_s22 = sadd.s32 4294967295, %s3075_s21   ;;  %p2452_p0 = scmp.ge.s32.totalorder %s3075_s21, 1  ;;  %s3075_s21 = sphi %s3121_s21, %s17_s21  }
   0x2   : > { %p225_p1 = scmp.lt.s32.totalorder %s3075_s21, 3 }
   0x4   : > { %p226_p2 = pnand %p2452_p0, %p225_p1 }
   0x6   : > { %229 = sbr.rel (%p226_p2) target bundleno = 624 (0x270), region = 40 }
   0xd   : > { %p265_p3 = scmp.lt.s32.totalorder %s2448_s22, 1  ;;  %s3077_s27 = smov 127   ;;  %vm434_vm0 = vcmask 556032   ;;  %v2835_v21 = vld [vmem:[%s4020_s3 + $0x4] ss:$16 sps:$4 sm:$0xff]   ;;  %v3082_v23 = vmov 0  }
   0xe   : > { %s3078_s28 = smov 126   ;;  %s3079_s29 = smov 110   ;;  %1790 = vmatprep.mubr.bf16.mxu1 %v2835_v21  ;;  %1564 = vmatprep.mubr.bf16.mxu0 %v2835_v21  ;;  %vm511_vm1 = vcmask 1039360   ;;  %vm605_vm2 = vcmask 1031168   ;;  %vm699_vm3 = vcmask 900096   ;;  %vm793_vm4 = vcmask 891904  }
   0xf   : > { %s4033_s22 = smov (!%p265_p3, %s2448_s22), 1  ;;  %s3080_s30 = smov 109   ;;  %2796 = vset.pattern.permute.xlu1 %v3082_v23  ;;  %2795 = vset.pattern.permute.xlu0 %v3082_v23  ;;  %vm887_vm5 = vcmask 883712   ;;  %vm981_vm6 = vcmask 752640   ;;  %vm1075_vm7 = vcmask 744448   ;;  %vm1169_vm8 = vcmask 736256  }
  0x10   : > { %s2776_s23 = smul.u32 72, %s4033_s22  ;;  %s3081_s9 = smov 108   ;;  %vm1507_vm9 = vcmask 392192  }
  0x11   : > { %s3083_s10 = smov 92   ;;  %s3084_s11 = smov 91  }
  0x12   : > { %s3135_s26 = scalar_lea.vmem %s4017_s0, %s2776_s23  ;;  %s3085_s12 = smov 90  }
  0x13   : > { %v3138_v0 = vld [vmem:[%s3135_s26 + $0x4] ss:$12 sps:$4 sm:$0xff]   ;;  %v3141_v1 = vld [vmem:[%s3135_s26] ss:$12 sps:$4 sm:$0xff]   ;;  %v2800_v2 = vld [vmem:[%s3135_s26 + $0x8] ss:$12 sps:$4 sm:$0xff]  }
  0x14   : > { %495 = vrot.lane.b32.xlu0 %v3138_v0, %s3077_s27  ;;  %1532 = vmatprep.subr.bf16.mxu0 %v3138_v0  ;;  %v3148_v3 = vld [vmem:[%s3135_s26 + $0x1c] ss:$12 sps:$4 sm:$0xff]   ;;  %v3152_v4 = vld [vmem:[%s3135_s26 + $0x18] ss:$12 sps:$4 sm:$0xff]   ;;  %v3155_v5 = vld [vmem:[%s3135_s26 + $0x34] ss:$12 sps:$4 sm:$0xff]  }
  0x15   : > { %493 = vrot.lane.b32.xlu1 %v3141_v1, %s3077_s27  ;;  %1533 = vmatpush1.bf16.msra.mxu0 %v3141_v1  ;;  %v2803_v6 = vld [vmem:[%s3135_s26 + $0x20] ss:$12 sps:$4 sm:$0xff]   ;;  %v3160_v7 = vld [vmem:[%s3135_s26 + $0x30] ss:$12 sps:$4 sm:$0xff]   ;;  %v2807_v8 = vld [vmem:[%s3135_s26 + $0x38] ss:$12 sps:$4 sm:$0xff]  }
  0x16   : > { %1534 = vmatprep.subr.bf16.mxu0 %v3148_v3  ;;  %v2809_v9 = vld [vmem:[%s3135_s26 + $0x8] ss:$12 sps:$4 sm:$0xff]   ;;  %v2810_v10 = vld [vmem:[%s3135_s26 + $0x20] ss:$12 sps:$4 sm:$0xff]   ;;  %v2811_v11 = vld [vmem:[%s3135_s26 + $0x38] ss:$12 sps:$4 sm:$0xff]  }
  0x17   : > { %v2830_v12 = vld [vmem:[%s3135_s26 + $0x8] ss:$12 sps:$4 sm:$0xff]   ;;  %v2831_v13 = vld [vmem:[%s3135_s26 + $0x20] ss:$12 sps:$4 sm:$0xff]   ;;  %v2832_v14 = vld [vmem:[%s3135_s26 + $0x38] ss:$12 sps:$4 sm:$0xff]  }
  0x18   : > { %497 = vrot.lane.b32.xlu0 %v2800_v2, %s3077_s27  ;;  %435 = vst.msk [vmem:[#allocation2 + $0x10] sm:$0xff] %vm434_vm0, %v2830_v12  ;;  %438 = vst.msk [vmem:[#allocation2 + $0x28] sm:$0xff] %vm434_vm0, %v2831_v13  ;;  %v2812_v15 = vld [vmem:[%s3135_s26 + $0x8] ss:$12 sps:$4 sm:$0xff]   ;;  %v2813_v16 = vld [vmem:[%s3135_s26 + $0x20] ss:$12 sps:$4 sm:$0xff]  }
  0x19   : > { %501 = vrot.lane.b32.xlu1 %v3148_v3, %s3077_s27  ;;  %1535 = vmatpush1.bf16.msra.mxu0 %v3152_v4  ;;  %441 = vst.msk [vmem:[#allocation2 + $0x40] sm:$0xff] %vm434_vm0, %v2832_v14  ;;  %v2814_v17 = vld [vmem:[%s3135_s26 + $0x38] ss:$12 sps:$4 sm:$0xff]   ;;  %v2815_v18 = vld [vmem:[%s3135_s26 + $0x8] ss:$12 sps:$4 sm:$0xff]  }
  0x1a   : > { %1536 = vmatprep.subr.bf16.mxu0 %v3155_v5  ;;  %v2816_v19 = vld [vmem:[%s3135_s26 + $0x20] ss:$12 sps:$4 sm:$0xff]   ;;  %v2817_v20 = vld [vmem:[%s3135_s26 + $0x38] ss:$12 sps:$4 sm:$0xff]   ;;  %v2818_v22 = vld [vmem:[%s3135_s26 + $0x8] ss:$12 sps:$4 sm:$0xff]  }
  0x1b   : > { %v2819_v24 = vld [vmem:[%s3135_s26 + $0x20] ss:$12 sps:$4 sm:$0xff]   ;;  %v2820_v25 = vld [vmem:[%s3135_s26 + $0x38] ss:$12 sps:$4 sm:$0xff]   ;;  %v2821_v26 = vld [vmem:[%s3135_s26 + $0x8] ss:$12 sps:$4 sm:$0xff]  }
  0x1c   : > { %503 = vrot.lane.b32.xlu0 %v2803_v6, %s3077_s27  ;;  %v2822_v27 = vld [vmem:[%s3135_s26 + $0x20] ss:$12 sps:$4 sm:$0xff]   ;;  %v2823_v28 = vld [vmem:[%s3135_s26 + $0x38] ss:$12 sps:$4 sm:$0xff]   ;;  %v2824_v29 = vld [vmem:[%s3135_s26 + $0x8] ss:$12 sps:$4 sm:$0xff]  }
  0x1d   : > { %499 = vrot.lane.b32.xlu1 %v3152_v4, %s3077_s27  ;;  %1537 = vmatpush1.bf16.msra.mxu0 %v3160_v7  ;;  %v2825_v30 = vld [vmem:[%s3135_s26 + $0x20] ss:$12 sps:$4 sm:$0xff]   ;;  %v2826_v34 = vld [vmem:[%s3135_s26 + $0x38] ss:$12 sps:$4 sm:$0xff]   ;;  %v2827_v42 = vld [vmem:[%s3135_s26 + $0x8] ss:$12 sps:$4 sm:$0xff]  }
  0x1e   : > { %v2828_v46 = vld [vmem:[%s3135_s26 + $0x20] ss:$12 sps:$4 sm:$0xff]   ;;  %v2829_v54 = vld [vmem:[%s3135_s26 + $0x38] ss:$12 sps:$4 sm:$0xff]  }
  0x20   : > { %507 = vrot.lane.b32.xlu0 %v3155_v5, %s3077_s27 }
  0x21   : > { %509 = vrot.lane.b32.xlu1 %v2807_v8, %s3077_s27 }
  0x24   : > { %505 = vrot.lane.b32.xlu0 %v3160_v7, %s3077_s27 }
  0x25   : > { %589 = vrot.lane.b32.xlu1 %v3138_v0, %s3078_s28 }
  0x28   : > { %591 = vrot.lane.b32.xlu0 %v2809_v9, %s3078_s28 }
  0x29   : > { %587 = vrot.lane.b32.xlu1 %v3141_v1, %s3078_s28 }
  0x2c   : > { %595 = vrot.lane.b32.xlu0 %v3148_v3, %s3078_s28 }
  0x2d   : > { %597 = vrot.lane.b32.xlu1 %v2810_v10, %s3078_s28  ;;  %v1199_v10 = vld [vmem:[#allocation2 + $0x28] sm:$0xff] }
  0x30   : > { %593 = vrot.lane.b32.xlu0 %v3152_v4, %s3078_s28 }
  0x31   : > { %601 = vrot.lane.b32.xlu1 %v3155_v5, %s3078_s28 }
  0x34   : > { %603 = vrot.lane.b32.xlu0 %v2811_v11, %s3078_s28 }
  0x35   : > { %599 = vrot.lane.b32.xlu1 %v3160_v7, %s3078_s28 }
  0x38   : > { %683 = vrot.lane.b32.xlu0 %v3138_v0, %s3079_s29 }
  0x39   : > { %685 = vrot.lane.b32.xlu1 %v2812_v15, %s3079_s29  ;;  %v318_v15 = vld [vmem:[%s4021_s4] sm:$0xff] }
  0x3c   : > { %681 = vrot.lane.b32.xlu0 %v3141_v1, %s3079_s29 }
  0x3d   : > { %689 = vrot.lane.b32.xlu1 %v3148_v3, %s3079_s29 }
  0x40   : > { %691 = vrot.lane.b32.xlu0 %v2813_v16, %s3079_s29  ;;  %v319_v16 = vld [vmem:[%s4021_s4 + $0x8] sm:$0xff] }
  0x41   : > { %687 = vrot.lane.b32.xlu1 %v3152_v4, %s3079_s29 }
  0x44   : > { %695 = vrot.lane.b32.xlu0 %v3155_v5, %s3079_s29 }
  0x45   : > { %697 = vrot.lane.b32.xlu1 %v2814_v17, %s3079_s29 }
  0x48   : > { %693 = vrot.lane.b32.xlu0 %v3160_v7, %s3079_s29  ;;  %s3530_s29 = smul.u32 96, %s4033_s22 }
  0x49   : > { %777 = vrot.lane.b32.xlu1 %v3138_v0, %s3080_s30 }
  0x4a   : > { %s3540_s8 = scalar_lea.vmem %s4018_s1, %s3530_s29  ;;  %s3846_s16 = scalar_lea.vmem %s4023_s6, %s3530_s29 }
  0x4b   : > { %s3990_s19 = scalar_lea.vmem %s4022_s5, %s3530_s29 }
  0x4c   : > { %779 = vrot.lane.b32.xlu0 %v2815_v18, %s3080_s30 }
  0x4d   : > { %775 = vrot.lane.b32.xlu1 %v3141_v1, %s3080_s30 }
  0x50   : > { %783 = vrot.lane.b32.xlu0 %v3148_v3, %s3080_s30 }
  0x51   : > { %785 = vrot.lane.b32.xlu1 %v2816_v19, %s3080_s30 }
  0x54   : > { %781 = vrot.lane.b32.xlu0 %v3152_v4, %s3080_s30 }
  0x55   : > { %789 = vrot.lane.b32.xlu1 %v3155_v5, %s3080_s30 }
  0x58   : > { %791 = vrot.lane.b32.xlu0 %v2817_v20, %s3080_s30  ;;  %v1202_v20 = vld [vmem:[#allocation2 + $0x40] sm:$0xff] }
  0x59   : > { %787 = vrot.lane.b32.xlu1 %v3160_v7, %s3080_s30 }
  0x5c   : > { %871 = vrot.lane.b32.xlu0 %v3138_v0, %s3081_s9 }
  0x5d   : > { %873 = vrot.lane.b32.xlu1 %v2818_v22, %s3081_s9 }
  0x60   : > { %869 = vrot.lane.b32.xlu0 %v3141_v1, %s3081_s9 }
  0x61   : > { %877 = vrot.lane.b32.xlu1 %v3148_v3, %s3081_s9 }
  0x64   : > { %879 = vrot.lane.b32.xlu0 %v2819_v24, %s3081_s9 }
  0x65   : > { %875 = vrot.lane.b32.xlu1 %v3152_v4, %s3081_s9 }
  0x68   : > { %883 = vrot.lane.b32.xlu0 %v3155_v5, %s3081_s9 }
  0x69   : > { %885 = vrot.lane.b32.xlu1 %v2820_v25, %s3081_s9 }
  0x6c   : > { %881 = vrot.lane.b32.xlu0 %v3160_v7, %s3081_s9 }
  0x6d   : > { %965 = vrot.lane.b32.xlu1 %v3138_v0, %s3083_s10 }
  0x70   : > { %967 = vrot.lane.b32.xlu0 %v2821_v26, %s3083_s10  ;;  %v321_v26 = vld [vmem:[%s4021_s4 + $0x18] sm:$0xff] }
  0x71   : > { %963 = vrot.lane.b32.xlu1 %v3141_v1, %s3083_s10 }
  0x74   : > { %971 = vrot.lane.b32.xlu0 %v3148_v3, %s3083_s10 }
  0x75   : > { %973 = vrot.lane.b32.xlu1 %v2822_v27, %s3083_s10  ;;  %v320_v27 = vld [vmem:[%s4021_s4 + $0x10] sm:$0xff] }
  0x78   : > { %969 = vrot.lane.b32.xlu0 %v3152_v4, %s3083_s10 }
  0x79   : > { %977 = vrot.lane.b32.xlu1 %v3155_v5, %s3083_s10 }
  0x7c   : > { %979 = vrot.lane.b32.xlu0 %v2823_v28, %s3083_s10 }
  0x7d   : > { %975 = vrot.lane.b32.xlu1 %v3160_v7, %s3083_s10 }
  0x80   : > { %1059 = vrot.lane.b32.xlu0 %v3138_v0, %s3084_s11 }
  0x81   : > { %1061 = vrot.lane.b32.xlu1 %v2824_v29, %s3084_s11 }
  0x84   : > { %1057 = vrot.lane.b32.xlu0 %v3141_v1, %s3084_s11 }
  0x85   : > { %1065 = vrot.lane.b32.xlu1 %v3148_v3, %s3084_s11 }
  0x86   : > { %v496_v31 = vpop.permute.xlu0 %495 }
  0x87   : > { %v494_v32 = vpop.permute.xlu1 %493 }
  0x88   : > { %v512_v33 = vsel %vm511_vm1, %v494_v32, %v496_v31  ;;  %1067 = vrot.lane.b32.xlu0 %v2825_v30, %s3084_s11 }
  0x89   : > { %1063 = vrot.lane.b32.xlu1 %v3152_v4, %s3084_s11 }
  0x8a   : > { %v498_v35 = vpop.permute.xlu0 %497 }
  0x8b   : > { %v513_v36 = vsel %vm511_vm1, %v496_v31, %v498_v35  ;;  %529 = vst.msk [vmem:[#allocation2 + $0x58] sm:$0xff] %vm434_vm0, %v498_v35  ;;  %v502_v37 = vpop.permute.xlu1 %501 }
  0x8c   : > { %1071 = vrot.lane.b32.xlu0 %v3155_v5, %s3084_s11  ;;  %1538 = vmatprep.subr.bf16.mxu0 %v513_v36 }
  0x8d   : > { %1073 = vrot.lane.b32.xlu1 %v2826_v34, %s3084_s11  ;;  %1539 = vmatpush1.bf16.msra.mxu0 %v512_v33 }
  0x8e   : > { %v504_v38 = vpop.permute.xlu0 %503 }
  0x8f   : > { %v515_v39 = vsel %vm511_vm1, %v502_v37, %v504_v38  ;;  %532 = vst.msk [vmem:[#allocation2 + $0x70] sm:$0xff] %vm434_vm0, %v504_v38  ;;  %v500_v40 = vpop.permute.xlu1 %499  ;;  %v322_v38 = vld [vmem:[%s4021_s4 + $0x20] sm:$0xff] }
  0x90   : > { %v514_v41 = vsel %vm511_vm1, %v500_v40, %v502_v37  ;;  %1069 = vrot.lane.b32.xlu0 %v3160_v7, %s3084_s11  ;;  %1540 = vmatprep.subr.bf16.mxu0 %v515_v39  ;;  %v323_v37 = vld [vmem:[%s4021_s4 + $0x28] sm:$0xff] }
  0x91   : > { %1153 = vrot.lane.b32.xlu1 %v3138_v0, %s3085_s12  ;;  %1541 = vmatpush1.bf16.msra.mxu0 %v514_v41 }
  0x92   : > { %v508_v43 = vpop.permute.xlu0 %507  ;;  %v1205_v33 = vld [vmem:[#allocation2 + $0x58] sm:$0xff] }
  0x93   : > { %v510_v44 = vpop.permute.xlu1 %509 }
  0x94   : > { %v517_v45 = vsel %vm511_vm1, %v508_v43, %v510_v44  ;;  %535 = vst.msk [vmem:[#allocation2 + $0x88] sm:$0xff] %vm434_vm0, %v510_v44  ;;  %1155 = vrot.lane.b32.xlu0 %v2827_v42, %s3085_s12 }
  0x95   : > { %1151 = vrot.lane.b32.xlu1 %v3141_v1, %s3085_s12  ;;  %1542 = vmatprep.subr.bf16.mxu0 %v517_v45 }
  0x96   : > { %v506_v47 = vpop.permute.xlu0 %505 }
  0x97   : > { %v516_v48 = vsel %vm511_vm1, %v506_v47, %v508_v43  ;;  %v590_v49 = vpop.permute.xlu1 %589  ;;  %v1208_v43 = vld [vmem:[#allocation2 + $0x70] sm:$0xff] }
  0x98   : > { %1159 = vrot.lane.b32.xlu0 %v3148_v3, %s3085_s12  ;;  %1543 = vmatpush1.bf16.msra.mxu0 %v516_v48 }
  0x99   : > { %1161 = vrot.lane.b32.xlu1 %v2828_v46, %s3085_s12 }
  0x9a   : > { %v592_v50 = vpop.permute.xlu0 %591 }
  0x9b   : > { %v607_v51 = vsel %vm605_vm2, %v590_v49, %v592_v50  ;;  %623 = vst.msk [vmem:[#allocation2 + $0xa0] sm:$0xff] %vm434_vm0, %v592_v50  ;;  %v588_v52 = vpop.permute.xlu1 %587  ;;  %v325_v50 = vld [vmem:[%s4021_s4 + $0x38] sm:$0xff] }
  0x9c   : > { %v606_v53 = vsel %vm605_vm2, %v588_v52, %v590_v49  ;;  %1157 = vrot.lane.b32.xlu0 %v3152_v4, %s3085_s12  ;;  %1544 = vmatprep.subr.bf16.mxu0 %v607_v51  ;;  %v1196_v4 = vld [vmem:[#allocation2 + $0x10] sm:$0xff]  ;;  %v1211_v49 = vld [vmem:[#allocation2 + $0x88] sm:$0xff] }
  0x9d   : > { %1165 = vrot.lane.b32.xlu1 %v3155_v5, %s3085_s12  ;;  %1545 = vmatpush1.bf16.msra.mxu0 %v606_v53  ;;  %v324_v51 = vld [vmem:[%s4021_s4 + $0x30] sm:$0xff] }
  0x9e   : > { %v596_v55 = vpop.permute.xlu0 %595 }
  0x9f   : > { %v598_v56 = vpop.permute.xlu1 %597 }
  0xa0   : > { %v609_v57 = vsel %vm605_vm2, %v596_v55, %v598_v56  ;;  %626 = vst.msk [vmem:[#allocation2 + $0xb8] sm:$0xff] %vm434_vm0, %v598_v56  ;;  %1167 = vrot.lane.b32.xlu0 %v2829_v54, %s3085_s12 }
  0xa1   : > { %1163 = vrot.lane.b32.xlu1 %v3160_v7, %s3085_s12  ;;  %1546 = vmatprep.subr.bf16.mxu0 %v609_v57 }
  0xa2   : > { %v594_v58 = vpop.permute.xlu0 %593 }
  0xa3   : > { %v608_v59 = vsel %vm605_vm2, %v594_v58, %v596_v55  ;;  %v602_v60 = vpop.permute.xlu1 %601 }
  0xa4   : > { %1547 = vmatpush1.bf16.msra.mxu0 %v608_v59  ;;  %1277 = vperm.xlu0 %2795, %v318_v15   ;;  %v1214_v59 = vld [vmem:[#allocation2 + $0xa0] sm:$0xff] }
  0xa5   : > { %1282 = vperm.xlu1 %2796, %v319_v16  }
  0xa6   : > { %v604_v61 = vpop.permute.xlu0 %603 }
  0xa7   : > { %v611_v62 = vsel %vm605_vm2, %v602_v60, %v604_v61  ;;  %629 = vst.msk [vmem:[#allocation2 + $0xd0] sm:$0xff] %vm434_vm0, %v604_v61  ;;  %v600_v63 = vpop.permute.xlu1 %599  ;;  %v327_v61 = vld [vmem:[%s4021_s4 + $0x48] sm:$0xff] }
  0xa8   : > { %v610_v0 = vsel %vm605_vm2, %v600_v63, %v602_v60  ;;  %1548 = vmatprep.subr.bf16.mxu0 %v611_v62  ;;  %1292 = vperm.xlu0 %2795, %v321_v26   ;;  %v2833_v60 = vld [vmem:[%s4020_s3] ss:$16 sps:$4 sm:$0xff]  }
  0xa9   : > { %1549 = vmatpush1.bf16.msra.mxu0 %v610_v0  ;;  %1287 = vperm.xlu1 %2796, %v320_v27   ;;  %v326_v62 = vld [vmem:[%s4021_s4 + $0x40] sm:$0xff] }
  0xaa   : > { %v684_v1 = vpop.permute.xlu0 %683  ;;  %v2836_v0 = vld [vmem:[%s4020_s3 + $0x24] ss:$16 sps:$4 sm:$0xff]  }
  0xab   : > { %v686_v2 = vpop.permute.xlu1 %685 }
  0xac   : > { %v701_v3 = vsel %vm699_vm3, %v684_v1, %v686_v2  ;;  %717 = vst.msk [vmem:[#allocation2 + $0xe8] sm:$0xff] %vm434_vm0, %v686_v2  ;;  %1302 = vperm.xlu0 %2795, %v323_v37  }
  0xad   : > { %1550 = vmatprep.subr.bf16.mxu0 %v701_v3  ;;  %1297 = vperm.xlu1 %2796, %v322_v38  }
  0xae   : > { %v682_v5 = vpop.permute.xlu0 %681  ;;  %v1220_v6 = vld [vmem:[#allocation2 + $0xd0] sm:$0xff] }
  0xaf   : > { %v700_v7 = vsel %vm699_vm3, %v682_v5, %v684_v1  ;;  %v690_v8 = vpop.permute.xlu1 %689  ;;  %2648 = vmatprep.subr.bf16.mxu1 %v1220_v6  ;;  %v292_v5 = vld [vmem:[%s4020_s3 + $0x30] sm:$0xff] }
  0xb0   : > { %2649 = vmatpush3.bf16.msra.mxu1 %v1196_v4  ;;  %1551 = vmatpush1.bf16.msra.mxu0 %v700_v7  ;;  %v290_v4 = vld [vmem:[%s4020_s3 + $0x20] sm:$0xff]  ;;  %v1217_v7 = vld [vmem:[#allocation2 + $0xb8] sm:$0xff] }
  0xb1   : > { %1312 = vperm.xlu0 %2795, %v325_v50   ;;  %1307 = vperm.xlu1 %2796, %v324_v51  }
  0xb2   : > { %v692_v9 = vpop.permute.xlu0 %691 }
  0xb3   : > { %v703_v11 = vsel %vm699_vm3, %v690_v8, %v692_v9  ;;  %720 = vst.msk [vmem:[#allocation2 + $0x100] sm:$0xff] %vm434_vm0, %v692_v9  ;;  %v688_v12 = vpop.permute.xlu1 %687  ;;  %v1223_v13 = vld [vmem:[#allocation2 + $0xe8] sm:$0xff]  ;;  %v328_v9 = vld [vmem:[%s4021_s4 + $0x50] sm:$0xff] }
  0xb4   : > { %v702_v14 = vsel %vm699_vm3, %v688_v12, %v690_v8  ;;  %2650 = vmatprep.subr.bf16.mxu1 %v1223_v13  ;;  %1552 = vmatprep.subr.bf16.mxu0 %v703_v11  ;;  %v329_v8 = vld [vmem:[%s4021_s4 + $0x58] sm:$0xff]  ;;  %v2566_v12 = vcombine.low %v290_v4, %v292_v5 }
  0xb5   : > { %2651 = vmatpush3.bf16.msra.mxu1 %v1199_v10  ;;  %1553 = vmatpush1.bf16.msra.mxu0 %v702_v14  ;;  %v2838_v14 = vld [vmem:[%s4020_s3 + $0x44] ss:$16 sps:$4 sm:$0xff]  }
  0xb6   : > { %v696_v17 = vpop.permute.xlu0 %695  ;;  %1322 = vperm.xlu0 %2795, %v327_v61   ;;  %1317 = vperm.xlu1 %2796, %v326_v62  }
  0xb7   : > { %v698_v18 = vpop.permute.xlu1 %697 }
  0xb8   : > { %v705_v19 = vsel %vm699_vm3, %v696_v17, %v698_v18  ;;  %723 = vst.msk [vmem:[#allocation2 + $0x118] sm:$0xff] %vm434_vm0, %v698_v18 }
  0xb9   : > { %1554 = vmatprep.subr.bf16.mxu0 %v705_v19 }
  0xba   : > { %v694_v21 = vpop.permute.xlu0 %693  ;;  %v1226_v22 = vld [vmem:[#allocation2 + $0x100] sm:$0xff]  ;;  %1332 = vperm.xlu0 %2795, %v329_v8   ;;  %1327 = vperm.xlu1 %2796, %v328_v9  }
  0xbb   : > { %v704_v24 = vsel %vm699_vm3, %v694_v21, %v696_v17  ;;  %v778_v25 = vpop.permute.xlu1 %777  ;;  %2652 = vmatprep.subr.bf16.mxu1 %v1226_v22  ;;  %v331_v17 = vld [vmem:[%s4021_s4 + $0x68] sm:$0xff]  ;;  %v294_v21 = vld [vmem:[%s4020_s3 + $0x40] sm:$0xff]  ;;  %v296_v22 = vld [vmem:[%s4020_s3 + $0x50] sm:$0xff] }
  0xbc   : > { %2653 = vmatpush3.bf16.msra.mxu1 %v1202_v20  ;;  %1555 = vmatpush1.bf16.msra.mxu0 %v704_v24  ;;  %v330_v20 = vld [vmem:[%s4021_s4 + $0x60] sm:$0xff] }
  0xbe   : > { %v780_v28 = vpop.permute.xlu0 %779  ;;  %1342 = vperm.xlu0 %2795, %v331_v17   ;;  %1337 = vperm.xlu1 %2796, %v330_v20  }
  0xbf   : > { %v795_v29 = vsel %vm793_vm4, %v778_v25, %v780_v28  ;;  %811 = vst.msk [vmem:[#allocation2 + $0x130] sm:$0xff] %vm434_vm0, %v780_v28  ;;  %v776_v30 = vpop.permute.xlu1 %775  ;;  %v1229_v31 = vld [vmem:[#allocation2 + $0x118] sm:$0xff]  ;;  %v2570_v28 = vcombine.low %v294_v21, %v296_v22 }
  0xc0   : > { %v794_v32 = vsel %vm793_vm4, %v776_v30, %v778_v25  ;;  %2654 = vmatprep.subr.bf16.mxu1 %v1229_v31  ;;  %1556 = vmatprep.subr.bf16.mxu0 %v795_v29  ;;  %v2840_v30 = vld [vmem:[%s4020_s3 + $0x64] ss:$16 sps:$4 sm:$0xff]   ;;  %v333_v31 = vld [vmem:[%s4021_s4 + $0x78] sm:$0xff] }
  0xc1   : > { %2655 = vmatpush3.bf16.msra.mxu1 %v1205_v33  ;;  %1557 = vmatpush1.bf16.msra.mxu0 %v794_v32  ;;  %v332_v32 = vld [vmem:[%s4021_s4 + $0x70] sm:$0xff]  ;;  %v2855_v21 = vld [vmem:[%s4020_s3 + $0xc] ss:$16 sps:$4 sm:$0xff]  }
  0xc2   : > { %v784_v34 = vpop.permute.xlu0 %783  ;;  %1352 = vperm.xlu0 %2795, %v333_v31   ;;  %1347 = vperm.xlu1 %2796, %v332_v32   ;;  %v2853_v32 = vld [vmem:[%s4020_s3 + $0x8] ss:$16 sps:$4 sm:$0xff]  }
  0xc3   : > { %v786_v35 = vpop.permute.xlu1 %785 }
  0xc4   : > { %v797_v36 = vsel %vm793_vm4, %v784_v34, %v786_v35  ;;  %814 = vst.msk [vmem:[#allocation2 + $0x148] sm:$0xff] %vm434_vm0, %v786_v35 }
  0xc5   : > { %1558 = vmatprep.subr.bf16.mxu0 %v797_v36 }
  0xc6   : > { %v782_v39 = vpop.permute.xlu0 %781  ;;  %v1232_v40 = vld [vmem:[#allocation2 + $0x130] sm:$0xff] }
  0xc7   : > { %v796_v41 = vsel %vm793_vm4, %v782_v39, %v784_v34  ;;  %v790_v42 = vpop.permute.xlu1 %789  ;;  %2656 = vmatprep.subr.bf16.mxu1 %v1232_v40  ;;  %v2842_v40 = vld [vmem:[%s4020_s3 + $0x60] ss:$16 sps:$4 sm:$0xff]  }
  0xc8   : > { %2657 = vmatpush3.bf16.msra.mxu1 %v1208_v43  ;;  %1559 = vmatpush1.bf16.msra.mxu0 %v796_v41 }
  0xca   : > { %v792_v44 = vpop.permute.xlu0 %791 }
  0xcb   : > { %v799_v45 = vsel %vm793_vm4, %v790_v42, %v792_v44  ;;  %817 = vst.msk [vmem:[#allocation2 + $0x160] sm:$0xff] %vm434_vm0, %v792_v44  ;;  %v788_v46 = vpop.permute.xlu1 %787  ;;  %v1235_v47 = vld [vmem:[#allocation2 + $0x148] sm:$0xff] }
  0xcc   : > { %v798_v48 = vsel %vm793_vm4, %v788_v46, %v790_v42  ;;  %2658 = vmatprep.subr.bf16.mxu1 %v1235_v47  ;;  %1560 = vmatprep.subr.bf16.mxu0 %v799_v45  ;;  %v2843_v42 = vld [vmem:[%s4020_s3 + $0x84] ss:$16 sps:$4 sm:$0xff]  }
  0xcd   : > { %2659 = vmatpush3.bf16.msra.mxu1 %v1211_v49  ;;  %1561 = vmatpush1.bf16.msra.mxu0 %v798_v48  ;;  %v302_v47 = vld [vmem:[%s4020_s3 + $0x80] sm:$0xff]  ;;  %v304_v48 = vld [vmem:[%s4020_s3 + $0x90] sm:$0xff] }
  0xce   : > { %v872_v52 = vpop.permute.xlu0 %871  ;;  %v2578_v51 = vcombine.low %v302_v47, %v304_v48 }
  0xcf   : > { %v874_v53 = vpop.permute.xlu1 %873 }
  0xd0   : > { %v889_v54 = vsel %vm887_vm5, %v872_v52, %v874_v53  ;;  %905 = vst.msk [vmem:[#allocation2 + $0x178] sm:$0xff] %vm434_vm0, %v874_v53  ;;  %v2845_v53 = vld [vmem:[%s4020_s3 + $0xa4] ss:$16 sps:$4 sm:$0xff]  }
  0xd1   : > { %1562 = vmatprep.subr.bf16.mxu0 %v889_v54 }
  0xd2   : > { %v870_v55 = vpop.permute.xlu0 %869  ;;  %v1238_v56 = vld [vmem:[#allocation2 + $0x160] sm:$0xff] }
  0xd3   : > { %v888_v57 = vsel %vm887_vm5, %v870_v55, %v872_v52  ;;  %v878_v58 = vpop.permute.xlu1 %877  ;;  %2660 = vmatprep.subr.bf16.mxu1 %v1238_v56 }
  0xd4   : > { %2661 = vmatpush3.bf16.msra.mxu1 %v1214_v59  ;;  %1563 = vmatpush1.bf16.msra.mxu0 %v888_v57  ;;  %v308_v59 = vld [vmem:[%s4020_s3 + $0xb0] sm:$0xff] }
  0xd6   : > { %v880_v63 = vpop.permute.xlu0 %879 }
  0xd7   : > { %v891_v1 = vsel %vm887_vm5, %v878_v58, %v880_v63  ;;  %908 = vst.msk [vmem:[#allocation2 + $0x190] sm:$0xff] %vm434_vm0, %v880_v63  ;;  %v876_v2 = vpop.permute.xlu1 %875  ;;  %v1241_v3 = vld [vmem:[#allocation2 + $0x178] sm:$0xff]  ;;  %1565 = vmatmul.mubr.bf16.vlgmr.msra.gmra.mrb[0].mxu0 %v2833_v60 }
  0xd8   : > { %v890_v6 = vsel %vm887_vm5, %v876_v2, %v878_v58  ;;  %2662 = vmatprep.subr.bf16.mxu1 %v1241_v3  ;;  %1645 = vmatprep.subr.bf16.mxu0 %v891_v1  ;;  %v306_v58 = vld [vmem:[%s4020_s3 + $0xa0] sm:$0xff] }
  0xd9   : > { %2663 = vmatpush3.bf16.msra.mxu1 %v1217_v7  ;;  %1646 = vmatpush1.bf16.msra.mxu0 %v890_v6  ;;  %v2847_v2 = vld [vmem:[%s4020_s3 + $0xc4] ss:$16 sps:$4 sm:$0xff]  }
  0xda   : > { %v884_v10 = vpop.permute.xlu0 %883  ;;  %1855 = vmatprep.subr.bf16.mxu1 %v3082_v23  ;;  %1574 = vmatprep.mubr.bf16.mxu0 %v2836_v0 }
  0xdb   : > { %v886_v11 = vpop.permute.xlu1 %885 }
  0xdc   : > { %v893_v13 = vsel %vm887_vm5, %v884_v10, %v886_v11  ;;  %911 = vst.msk [vmem:[#allocation2 + $0x1a8] sm:$0xff] %vm434_vm0, %v886_v11  ;;  %1791 = vmatmul.mubr.bf16.vlgmr.msra.gmra.mrb[0].mxu1 %v2833_v60 }
  0xdd   : > { %1647 = vmatprep.subr.bf16.mxu0 %v893_v13  ;;  %1798 = vmatprep.mubr.bf16.mxu1 %v2836_v0  ;;  %v2582_v0 = vcombine.low %v306_v58, %v308_v59 }
  0xde   : > { %v882_v15 = vpop.permute.xlu0 %881  ;;  %v1244_v16 = vld [vmem:[#allocation2 + $0x190] sm:$0xff] }
  0xdf   : > { %v892_v18 = vsel %vm887_vm5, %v882_v15, %v884_v10  ;;  %v966_v19 = vpop.permute.xlu1 %965  ;;  %1856 = vmatpush1.bf16.msra.mxu1 %v1244_v16  ;;  %1575 = vmatmul.mubr.bf16.gmra.mrb[4].mxu0 %v2566_v12  ;;  %v2849_v10 = vld [vmem:[%s4020_s3 + $0xc0] ss:$16 sps:$4 sm:$0xff]  }
  0xe0   : > { %1857 = vmatprep.subr.bf16.mxu1 %v3082_v23  ;;  %1648 = vmatpush1.bf16.msra.mxu0 %v892_v18 }
  0xe1   : > { %1584 = vmatprep.mubr.bf16.mxu0 %v2838_v14 }
  0xe2   : > { %v968_v24 = vpop.permute.xlu0 %967 }
  0xe3   : > { %v983_v25 = vsel %vm981_vm6, %v966_v19, %v968_v24  ;;  %999 = vst.msk [vmem:[#allocation2 + $0x1c0] sm:$0xff] %vm434_vm0, %v968_v24  ;;  %v964_v26 = vpop.permute.xlu1 %963  ;;  %v1247_v27 = vld [vmem:[#allocation2 + $0x1a8] sm:$0xff] }
  0xe4   : > { %v982_v29 = vsel %vm981_vm6, %v964_v26, %v966_v19  ;;  %1858 = vmatpush1.bf16.msra.mxu1 %v1247_v27  ;;  %1649 = vmatprep.subr.bf16.mxu0 %v983_v25  ;;  %v2852_v19 = vld [vmem:[%s4020_s3 + $0xe0] ss:$16 sps:$4 sm:$0xff]  }
  0xe5   : > { %1799 = vmatmul.mubr.bf16.gmra.mrb[4].mxu1 %v2566_v12  ;;  %1859 = vmatprep.subr.bf16.mxu1 %v3082_v23  ;;  %v2850_v12 = vld [vmem:[%s4020_s3 + $0xe4] ss:$16 sps:$4 sm:$0xff]  }
  0xe6   : > { %v972_v33 = vpop.permute.xlu0 %971  ;;  %1650 = vmatpush1.bf16.msra.mxu0 %v982_v29  ;;  %1806 = vmatprep.mubr.bf16.mxu1 %v2838_v14 }
  0xe7   : > { %v974_v34 = vpop.permute.xlu1 %973  ;;  %1585 = vmatmul.mubr.bf16.gmra.mrb[8].mxu0 %v2570_v28 }
  0xe8   : > { %v985_v35 = vsel %vm981_vm6, %v972_v33, %v974_v34  ;;  %1002 = vst.msk [vmem:[#allocation2 + $0x1d8] sm:$0xff] %vm434_vm0, %v974_v34  ;;  %1594 = vmatprep.mubr.bf16.mxu0 %v2840_v30 }
  0xe9   : > { %1651 = vmatprep.subr.bf16.mxu0 %v985_v35  ;;  %v2859_v35 = vld [vmem:[%s4020_s3 + $0x4c] ss:$16 sps:$4 sm:$0xff]  }
  0xea   : > { %v970_v36 = vpop.permute.xlu0 %969  ;;  %v1250_v37 = vld [vmem:[#allocation2 + $0x1c0] sm:$0xff] }
  0xeb   : > { %v984_v38 = vsel %vm981_vm6, %v970_v36, %v972_v33  ;;  %v978_v39 = vpop.permute.xlu1 %977  ;;  %1860 = vmatpush1.bf16.msra.mxu1 %v1250_v37  ;;  %v2856_v33 = vld [vmem:[%s4020_s3 + $0x2c] ss:$16 sps:$4 sm:$0xff]   ;;  %v2861_v36 = vld [vmem:[%s4020_s3 + $0x48] ss:$16 sps:$4 sm:$0xff]  }
  0xec   : > { %1861 = vmatprep.subr.bf16.mxu1 %v3082_v23  ;;  %1652 = vmatpush1.bf16.msra.mxu0 %v984_v38  ;;  %v2862_v37 = vld [vmem:[%s4020_s3 + $0x6c] ss:$16 sps:$4 sm:$0xff]   ;;  %v2864_v38 = vld [vmem:[%s4020_s3 + $0x68] ss:$16 sps:$4 sm:$0xff]  }
  0xed   : > { %1807 = vmatmul.mubr.bf16.gmra.mrb[8].mxu1 %v2570_v28 }
  0xee   : > { %v980_v41 = vpop.permute.xlu0 %979  ;;  %1814 = vmatprep.mubr.bf16.mxu1 %v2840_v30 }
  0xef   : > { %v987_v43 = vsel %vm981_vm6, %v978_v39, %v980_v41  ;;  %1005 = vst.msk [vmem:[#allocation2 + $0x1f0] sm:$0xff] %vm434_vm0, %v980_v41  ;;  %v976_v44 = vpop.permute.xlu1 %975  ;;  %v1253_v45 = vld [vmem:[#allocation2 + $0x1d8] sm:$0xff]  ;;  %1595 = vmatmul.mubr.bf16.gmra.mrb[12].mxu0 %v2842_v40 }
  0xf0   : > { %v986_v46 = vsel %vm981_vm6, %v976_v44, %v978_v39  ;;  %1862 = vmatpush1.bf16.msra.mxu1 %v1253_v45  ;;  %1653 = vmatprep.subr.bf16.mxu0 %v987_v43  ;;  %v2865_v39 = vld [vmem:[%s4020_s3 + $0x8c] ss:$16 sps:$4 sm:$0xff]   ;;  %v2873_v44 = vld [vmem:[%s4020_s3 + $0xc8] ss:$16 sps:$4 sm:$0xff]  }
  0xf1   : > { %1863 = vmatprep.subr.bf16.mxu1 %v3082_v23  ;;  %1654 = vmatpush1.bf16.msra.mxu0 %v986_v46  ;;  %v2868_v41 = vld [vmem:[%s4020_s3 + $0xac] ss:$16 sps:$4 sm:$0xff]   ;;  %v2876_v46 = vld [vmem:[%s4020_s3 + $0xe8] ss:$16 sps:$4 sm:$0xff]  }
  0xf2   : > { %v1060_v49 = vpop.permute.xlu0 %1059  ;;  %1604 = vmatprep.mubr.bf16.mxu0 %v2843_v42  ;;  %v2871_v43 = vld [vmem:[%s4020_s3 + $0xcc] ss:$16 sps:$4 sm:$0xff]  }
  0xf3   : > { %v1062_v50 = vpop.permute.xlu1 %1061  ;;  %v2874_v45 = vld [vmem:[%s4020_s3 + $0xec] ss:$16 sps:$4 sm:$0xff]  }
  0xf4   : > { %v1077_v52 = vsel %vm1075_vm7, %v1060_v49, %v1062_v50  ;;  %1093 = vst.msk [vmem:[#allocation2 + $0x208] sm:$0xff] %vm434_vm0, %v1062_v50 }
  0xf5   : > { %1815 = vmatmul.mubr.bf16.gmra.mrb[12].mxu1 %v2842_v40  ;;  %1655 = vmatprep.subr.bf16.mxu0 %v1077_v52  ;;  %v2867_v40 = vld [vmem:[%s4020_s3 + $0x88] ss:$16 sps:$4 sm:$0xff]  }
  0xf6   : > { %v1058_v54 = vpop.permute.xlu0 %1057  ;;  %v1256_v55 = vld [vmem:[#allocation2 + $0x1f0] sm:$0xff]  ;;  %1822 = vmatprep.mubr.bf16.mxu1 %v2843_v42  ;;  %v2870_v42 = vld [vmem:[%s4020_s3 + $0xa8] ss:$16 sps:$4 sm:$0xff]  }
  0xf7   : > { %v1076_v56 = vsel %vm1075_vm7, %v1058_v54, %v1060_v49  ;;  %v1066_v57 = vpop.permute.xlu1 %1065  ;;  %1864 = vmatpush1.bf16.msra.mxu1 %v1256_v55  ;;  %1605 = vmatmul.mubr.bf16.gmra.mrb[16].mxu0 %v2578_v51 }
  0xf8   : > { %1865 = vmatprep.subr.bf16.mxu1 %v3082_v23  ;;  %1656 = vmatpush1.bf16.msra.mxu0 %v1076_v56 }
  0xf9   : > { %1614 = vmatprep.mubr.bf16.mxu0 %v2845_v53 }
  0xfa   : > { %v1068_v60 = vpop.permute.xlu0 %1067 }
  0xfb   : > { %v1079_v61 = vsel %vm1075_vm7, %v1066_v57, %v1068_v60  ;;  %1096 = vst.msk [vmem:[#allocation2 + $0x220] sm:$0xff] %vm434_vm0, %v1068_v60  ;;  %v1064_v62 = vpop.permute.xlu1 %1063  ;;  %v1259_v63 = vld [vmem:[#allocation2 + $0x208] sm:$0xff] }
  0xfc   : > { %v1078_v1 = vsel %vm1075_vm7, %v1064_v62, %v1066_v57  ;;  %1866 = vmatpush1.bf16.msra.mxu1 %v1259_v63  ;;  %1657 = vmatprep.subr.bf16.mxu0 %v1079_v61 }
  0xfd   : > { %1823 = vmatmul.mubr.bf16.gmra.mrb[16].mxu1 %v2578_v51  ;;  %1867 = vmatprep.subr.bf16.mxu1 %v3082_v23 }
  0xfe   : > { %v1072_v3 = vpop.permute.xlu0 %1071  ;;  %1658 = vmatpush1.bf16.msra.mxu0 %v1078_v1  ;;  %1830 = vmatprep.mubr.bf16.mxu1 %v2845_v53 }
  0xff   : > { %v1074_v4 = vpop.permute.xlu1 %1073  ;;  %1615 = vmatmul.mubr.bf16.gmra.mrb[20].mxu0 %v2582_v0 }
 0x100   : > { %v1081_v5 = vsel %vm1075_vm7, %v1072_v3, %v1074_v4  ;;  %1099 = vst.msk [vmem:[#allocation2 + $0x238] sm:$0xff] %vm434_vm0, %v1074_v4  ;;  %1624 = vmatprep.mubr.bf16.mxu0 %v2847_v2 }
 0x101   : > { %1659 = vmatprep.subr.bf16.mxu0 %v1081_v5 }
 0x102   : > { %v1070_v6 = vpop.permute.xlu0 %1069  ;;  %v1262_v7 = vld [vmem:[#allocation2 + $0x220] sm:$0xff] }
 0x103   : > { %v1080_v8 = vsel %vm1075_vm7, %v1070_v6, %v1072_v3  ;;  %v1154_v9 = vpop.permute.xlu1 %1153  ;;  %1868 = vmatpush1.bf16.msra.mxu1 %v1262_v7 }
 0x104   : > { %1869 = vmatprep.subr.bf16.mxu1 %v3082_v23  ;;  %1660 = vmatpush1.bf16.msra.mxu0 %v1080_v8 }
 0x105   : > { %1831 = vmatmul.mubr.bf16.gmra.mrb[20].mxu1 %v2582_v0 }
 0x106   : > { %v1156_v11 = vpop.permute.xlu0 %1155  ;;  %1838 = vmatprep.mubr.bf16.mxu1 %v2847_v2 }
 0x107   : > { %v1171_v13 = vsel %vm1169_vm8, %v1154_v9, %v1156_v11  ;;  %1187 = vst.msk [vmem:[#allocation2 + $0x250] sm:$0xff] %vm434_vm0, %v1156_v11  ;;  %v1152_v14 = vpop.permute.xlu1 %1151  ;;  %v1265_v15 = vld [vmem:[#allocation2 + $0x238] sm:$0xff]  ;;  %1625 = vmatmul.mubr.bf16.gmra.mrb[24].mxu0 %v2849_v10 }
 0x108   : > { %v1170_v16 = vsel %vm1169_vm8, %v1152_v14, %v1154_v9  ;;  %1870 = vmatpush1.bf16.msra.mxu1 %v1265_v15  ;;  %1661 = vmatprep.subr.bf16.mxu0 %v1171_v13 }
 0x109   : > { %1871 = vmatprep.subr.bf16.mxu1 %v3082_v23  ;;  %1662 = vmatpush1.bf16.msra.mxu0 %v1170_v16 }
 0x10a   : > { %v1160_v17 = vpop.permute.xlu0 %1159  ;;  %1634 = vmatprep.mubr.bf16.mxu0 %v2850_v12 }
 0x10b   : > { %v1162_v18 = vpop.permute.xlu1 %1161 }
 0x10c   : > { %v1173_v20 = vsel %vm1169_vm8, %v1160_v17, %v1162_v18  ;;  %1190 = vst.msk [vmem:[#allocation2 + $0x268] sm:$0xff] %vm434_vm0, %v1162_v18 }
 0x10d   : > { %1839 = vmatmul.mubr.bf16.gmra.mrb[24].mxu1 %v2849_v10  ;;  %1663 = vmatprep.subr.bf16.mxu0 %v1173_v20 }
 0x10e   : > { %v1158_v22 = vpop.permute.xlu0 %1157  ;;  %v1268_v24 = vld [vmem:[#allocation2 + $0x250] sm:$0xff]  ;;  %1846 = vmatprep.mubr.bf16.mxu1 %v2850_v12 }
 0x10f   : > { %v1172_v25 = vsel %vm1169_vm8, %v1158_v22, %v1160_v17  ;;  %v1166_v26 = vpop.permute.xlu1 %1165  ;;  %1872 = vmatpush1.bf16.msra.mxu1 %v1268_v24  ;;  %1635 = vmatmul.mubr.bf16.gmra.mrb[28].mxu0 %v2852_v19 }
 0x110   : > { %1873 = vmatprep.subr.bf16.mxu1 %v3082_v23  ;;  %1664 = vmatpush1.bf16.msra.mxu0 %v1172_v25 }
 0x111   : > { %2594 = vmatprep.mubr.msk.bf16.mxu0 %vm1507_vm9, %v2855_v21 }
 0x112   : > { %v1168_v27 = vpop.permute.xlu0 %1167 }
 0x113   : > { %v1175_v28 = vsel %vm1169_vm8, %v1166_v26, %v1168_v27  ;;  %1193 = vst.msk [vmem:[#allocation2 + $0x280] sm:$0xff] %vm434_vm0, %v1168_v27  ;;  %v1164_v29 = vpop.permute.xlu1 %1163  ;;  %v1271_v30 = vld [vmem:[#allocation2 + $0x268] sm:$0xff]  ;;  %v334_v27 = vld [vmem:[%s4019_s2] sm:$0xff] }
 0x114   : > { %v1174_v31 = vsel %vm1169_vm8, %v1164_v29, %v1166_v26  ;;  %1874 = vmatpush1.bf16.msra.mxu1 %v1271_v30  ;;  %1665 = vmatprep.subr.bf16.mxu0 %v1175_v28  ;;  %v3546_v28 = vld [vmem:[%s3540_s8] sm:$0xff]  ;;  %v335_v30 = vld [vmem:[%s4019_s2 + $0x8] sm:$0xff] }
 0x115   : > { %1847 = vmatmul.mubr.bf16.gmra.mrb[28].mxu1 %v2852_v19  ;;  %1875 = vmatprep.subr.bf16.mxu1 %v3082_v23  ;;  %v2858_v23 = vld [vmem:[%s4020_s3 + $0x28] ss:$16 sps:$4 sm:$0xff]  }
 0x116   : > { %1666 = vmatpush1.bf16.msra.mxu0 %v1174_v31  ;;  %2602 = vmatprep.mubr.msk.bf16.mxu1 %vm1507_vm9, %v2855_v21  ;;  %v3552_v31 = vld [vmem:[%s3540_s8 + $0x8] sm:$0xff] }
 0x119   : > { %1678 = vmatmul.mubr.bf16.vlgmr.msra.gmra.mrb[0].mxu0 %v2853_v32 }
 0x11a   : > { %v1274_v34 = vld [vmem:[#allocation2 + $0x280] sm:$0xff]  ;;  %2595 = vmatprep.mubr.msk.bf16.mxu0 %vm1507_vm9, %v2856_v33 }
 0x11b   : > { %1876 = vmatpush1.bf16.msra.mxu1 %v1274_v34  ;;  %v337_v34 = vld [vmem:[%s4019_s2 + $0x18] sm:$0xff] }
 0x11e   : > { %1888 = vmatmul.mubr.bf16.vlgmr.msra.gmra.mrb[32].mxu1 %v2853_v32 }
 0x11f   : > { %2603 = vmatprep.mubr.msk.bf16.mxu1 %vm1507_vm9, %v2856_v33 }
 0x121   : > { %1688 = vmatmul.mubr.bf16.gmra.mrb[4].mxu0 %v2858_v23 }
 0x122   : > { %2596 = vmatprep.mubr.msk.bf16.mxu0 %vm1507_vm9, %v2859_v35 }
 0x126   : > { %1896 = vmatmul.mubr.bf16.gmra.mrb[36].mxu1 %v2858_v23  ;;  %v3560_v23 = vld [vmem:[%s3540_s8 + $0x18] sm:$0xff] }
 0x127   : > { %2604 = vmatprep.mubr.msk.bf16.mxu1 %vm1507_vm9, %v2859_v35 }
 0x129   : > { %1698 = vmatmul.mubr.bf16.gmra.mrb[8].mxu0 %v2861_v36 }
 0x12a   : > { %2597 = vmatprep.mubr.msk.bf16.mxu0 %vm1507_vm9, %v2862_v37 }
 0x12e   : > { %1904 = vmatmul.mubr.bf16.gmra.mrb[40].mxu1 %v2861_v36  ;;  %v1964_v36 = vmul.f32 %v3546_v28, %v334_v27  ;;  %v3612_v27 = vld [vmem:[%s3540_s8 + $0x50] sm:$0xff] }
 0x12f   : > { %2605 = vmatprep.mubr.msk.bf16.mxu1 %vm1507_vm9, %v2862_v37  ;;  %v338_v37 = vld [vmem:[%s4019_s2 + $0x20] sm:$0xff] }
 0x131   : > { %1708 = vmatmul.mubr.bf16.gmra.mrb[12].mxu0 %v2864_v38 }
 0x132   : > { %2598 = vmatprep.mubr.msk.bf16.mxu0 %vm1507_vm9, %v2865_v39 }
 0x136   : > { %1912 = vmatmul.mubr.bf16.gmra.mrb[44].mxu1 %v2864_v38  ;;  %v3567_v38 = vld [vmem:[%s3540_s8 + $0x20] sm:$0xff] }
 0x137   : > { %2606 = vmatprep.mubr.msk.bf16.mxu1 %vm1507_vm9, %v2865_v39  ;;  %v1278_v39 = vpop.permute.xlu0 %1277 }
 0x139   : > { %1718 = vmatmul.mubr.bf16.gmra.mrb[16].mxu0 %v2867_v40 }
 0x13a   : > { %2599 = vmatprep.mubr.msk.bf16.mxu0 %vm1507_vm9, %v2868_v41 }
 0x13e   : > { %1920 = vmatmul.mubr.bf16.gmra.mrb[48].mxu1 %v2867_v40 }
 0x13f   : > { %2607 = vmatprep.mubr.msk.bf16.mxu1 %vm1507_vm9, %v2868_v41 }
 0x141   : > { %1728 = vmatmul.mubr.bf16.gmra.mrb[20].mxu0 %v2870_v42 }
 0x142   : > { %2600 = vmatprep.mubr.msk.bf16.mxu0 %vm1507_vm9, %v2871_v43 }
 0x146   : > { %1928 = vmatmul.mubr.bf16.gmra.mrb[52].mxu1 %v2870_v42  ;;  %v1965_v42 = vmul.f32 %v3552_v31, %v335_v30 }
 0x147   : > { %2608 = vmatprep.mubr.msk.bf16.mxu1 %vm1507_vm9, %v2871_v43  ;;  %v336_v43 = vld [vmem:[%s4019_s2 + $0x10] sm:$0xff] }
 0x149   : > { %1738 = vmatmul.mubr.bf16.gmra.mrb[24].mxu0 %v2873_v44 }
 0x14a   : > { %2601 = vmatprep.mubr.msk.bf16.mxu0 %vm1507_vm9, %v2874_v45 }
 0x14e   : > { %1936 = vmatmul.mubr.bf16.gmra.mrb[56].mxu1 %v2873_v44  ;;  %v3576_v44 = vld [vmem:[%s3540_s8 + $0x10] sm:$0xff] }
 0x14f   : > { %2609 = vmatprep.mubr.msk.bf16.mxu1 %vm1507_vm9, %v2874_v45 }
 0x151   : > { %1748 = vmatmul.mubr.bf16.gmra.mrb[28].mxu0 %v2876_v46 }
 0x156   : > { %1944 = vmatmul.mubr.bf16.gmra.mrb[60].mxu1 %v2876_v46 }
 0x1af   : > { %v2664_v47 = vpop.f32.mrb[0].mxu1 }
 0x1b0   : > { %v2665_v48 = vpop.f32.mrb[1].mxu1 }
 0x1b1   : > { %v3505_v49 = vadd.f32 %v2665_v48, %v2664_v47  ;;  %v2667_v50 = vpop.f32.mrb[2].mxu1  ;;  %v1967_v47 = vmul.f32 %v3560_v23, %v337_v34  ;;  %v1283_v48 = vpop.permute.xlu1 %1282 }
 0x1b2   : > { %v2668_v51 = vpop.f32.mrb[3].mxu1 }
 0x1b3   : > { %v3507_v52 = vadd.f32 %v2668_v51, %v2667_v50  ;;  %v339_v50 = vld [vmem:[%s4019_s2 + $0x28] sm:$0xff] }
 0x1b4   : > { %v3583_v51 = vld [vmem:[%s3540_s8 + $0x28] sm:$0xff] }
 0x1b8   : > { %v2670_v53 = vpop.f32.mrb[4].mxu1 }
 0x1b9   : > { %v2671_v54 = vpop.f32.mrb[5].mxu1 }
 0x1ba   : > { %v3509_v55 = vadd.f32 %v2671_v54, %v2670_v53  ;;  %v2673_v56 = vpop.f32.mrb[6].mxu1 }
 0x1bb   : > { %v2674_v57 = vpop.f32.mrb[7].mxu1 }
 0x1bc   : > { %v3511_v58 = vadd.f32 %v2674_v57, %v2673_v56  ;;  %v1968_v56 = vmul.f32 %v3567_v38, %v338_v37 }
 0x1c0   : > { %v2676_v59 = vpop.f32.mrb[8].mxu1 }
 0x1c1   : > { %v2677_v60 = vpop.f32.mrb[9].mxu1 }
 0x1c2   : > { %v3513_v61 = vadd.f32 %v2677_v60, %v2676_v59  ;;  %v2679_v62 = vpop.f32.mrb[10].mxu1 }
 0x1c3   : > { %v2680_v63 = vpop.f32.mrb[11].mxu1 }
 0x1c4   : > { %v3515_v0 = vadd.f32 %v2680_v63, %v2679_v62  ;;  %v340_v62 = vld [vmem:[%s4019_s2 + $0x30] sm:$0xff]  ;;  %v1793_v63 = vadd.f32 %v3505_v49, %v1278_v39  ;;  %v343_v49 = vld [vmem:[%s4019_s2 + $0x48] sm:$0xff] }
 0x1c8   : > { %v2682_v1 = vpop.f32.mrb[12].mxu1 }
 0x1c9   : > { %v2683_v2 = vpop.f32.mrb[13].mxu1 }
 0x1ca   : > { %v3517_v3 = vadd.f32 %v2683_v2, %v2682_v1  ;;  %v2685_v4 = vpop.f32.mrb[14].mxu1  ;;  %v1966_v1 = vmul.f32 %v3576_v44, %v336_v43 }
 0x1cb   : > { %v2686_v5 = vpop.f32.mrb[15].mxu1 }
 0x1cc   : > { %v3519_v6 = vadd.f32 %v2686_v5, %v2685_v4  ;;  %v3592_v5 = vld [vmem:[%s3540_s8 + $0x30] sm:$0xff] }
 0x1cd   : > { %v1970_v34 = vmul.f32 %v3592_v5, %v340_v62 }
 0x1d0   : > { %v2688_v7 = vpop.f32.mrb[16].mxu1 }
 0x1d1   : > { %v2689_v8 = vpop.f32.mrb[17].mxu1 }
 0x1d2   : > { %v3521_v9 = vadd.f32 %v2689_v8, %v2688_v7  ;;  %v2691_v10 = vpop.f32.mrb[18].mxu1  ;;  %v341_v7 = vld [vmem:[%s4019_s2 + $0x38] sm:$0xff] }
 0x1d3   : > { %v2692_v11 = vpop.f32.mrb[19].mxu1  ;;  %v3598_v8 = vld [vmem:[%s3540_s8 + $0x38] sm:$0xff] }
 0x1d4   : > { %v3523_v12 = vadd.f32 %v2692_v11, %v2691_v10 }
 0x1d8   : > { %v2694_v13 = vpop.f32.mrb[20].mxu1 }
 0x1d9   : > { %v2695_v14 = vpop.f32.mrb[21].mxu1 }
 0x1da   : > { %v3525_v15 = vadd.f32 %v2695_v14, %v2694_v13  ;;  %v2697_v16 = vpop.f32.mrb[22].mxu1  ;;  %v1969_v13 = vmul.f32 %v3583_v51, %v339_v50  ;;  %v1293_v50 = vpop.permute.xlu0 %1292 }
 0x1db   : > { %v2698_v17 = vpop.f32.mrb[23].mxu1 }
 0x1dc   : > { %v3527_v18 = vadd.f32 %v2698_v17, %v2697_v16 }
 0x1e0   : > { %v2700_v19 = vpop.f32.mrb[24].mxu1 }
 0x1e1   : > { %v2701_v20 = vpop.f32.mrb[25].mxu1 }
 0x1e2   : > { %v3532_v21 = vadd.f32 %v2701_v20, %v2700_v19  ;;  %v2703_v22 = vpop.f32.mrb[26].mxu1  ;;  %v1796_v19 = vadd.f32 %v3507_v52, %v1283_v48 }
 0x1e3   : > { %v2704_v24 = vpop.f32.mrb[27].mxu1 }
 0x1e4   : > { %v3534_v25 = vadd.f32 %v2704_v24, %v2703_v22  ;;  %v3606_v24 = vld [vmem:[%s3540_s8 + $0x48] sm:$0xff] }
 0x1e8   : > { %v2706_v26 = vpop.f32.mrb[28].mxu1 }
 0x1e9   : > { %v2707_v29 = vpop.f32.mrb[29].mxu1 }
 0x1ea   : > { %v3554_v32 = vadd.f32 %v2707_v29, %v2706_v26  ;;  %v2709_v33 = vpop.f32.mrb[30].mxu1  ;;  %v344_v26 = vld [vmem:[%s4019_s2 + $0x50] sm:$0xff]  ;;  %v1288_v29 = vpop.permute.xlu1 %1287 }
 0x1eb   : > { %v2710_v35 = vpop.f32.mrb[31].mxu1  ;;  %v1801_v62 = vadd.f32 %v3509_v55, %v1288_v29  ;;  %v1804_v55 = vadd.f32 %v3511_v58, %v1293_v50  ;;  %v2461_v58 = vld [vmem:[%s4019_s2 + $0x80] sm:$0xff] }
 0x1ec   : > { %v3569_v40 = vadd.f32 %v2710_v35, %v2709_v33  ;;  %v1679_v41 = vpop.f32.mrb[0].mxu0  ;;  %v1971_v35 = vmul.f32 %v3598_v8, %v341_v7 }
 0x1ed   : > { %v2712_v45 = vadd.f32 %v1679_v41, %v1278_v39  ;;  %v1681_v46 = vpop.f32.mrb[1].mxu0  ;;  %v342_v41 = vld [vmem:[%s4019_s2 + $0x40] sm:$0xff] }
 0x1ee   : > { %v2713_v53 = vadd.f32 %v1681_v46, %v1278_v39  ;;  %v1683_v54 = vpop.f32.mrb[2].mxu0 }
 0x1ef   : > { %v1976_v57 = vadd.f32 %v2712_v45, %v1964_v36  ;;  %v2714_v59 = vadd.f32 %v1683_v54, %v1283_v48  ;;  %v1685_v60 = vpop.f32.mrb[3].mxu0 }
 0x1f0   : > { %v1977_v2 = vadd.f32 %v2713_v53, %v1965_v42  ;;  %v2715_v4 = vadd.f32 %v1685_v60, %v1283_v48  ;;  %v3620_v42 = vld [vmem:[%s3540_s8 + $0x40] sm:$0xff]  ;;  %v1974_v48 = vmul.f32 %v3612_v27, %v344_v26 }
 0x1f1   : > { %v1889_v10 = vpop.f32.mrb[32].mxu1  ;;  %v2610_v11 = vmul.f32 -1.442695, %v1976_v57  ;;  %v1979_v14 = vadd.f32 %v2714_v59, %v1967_v47  ;;  %v1973_v47 = vmul.f32 %v3606_v24, %v343_v49  ;;  %v3628_v57 = vld [vmem:[%s3540_s8 + $0x58] sm:$0xff] }
 0x1f2   : > { %v1890_v16 = vadd.f32 %v1889_v10, %v1793_v63  ;;  %v1891_v17 = vpop.f32.mrb[33].mxu1  ;;  %v2611_v20 = vmul.f32 -1.442695, %v1977_v2  ;;  %v1980_v22 = vadd.f32 %v2715_v4, %v1968_v56  ;;  %v345_v56 = vld [vmem:[%s4019_s2 + $0x58] sm:$0xff]  ;;  %v1972_v63 = vmul.f32 %v3620_v42, %v342_v41 }
 0x1f3   : > { %2877 = vpow2.f32 %v2610_v11  ;;  %v1892_v30 = vpop.f32.mrb[34].mxu1  ;;  %v2613_v33 = vmul.f32 -1.442695, %v1979_v14  ;;  %v2457_v14 = vld [vmem:[%s4019_s2 + $0x60] sm:$0xff]  ;;  %v1975_v17 = vmul.f32 %v3628_v57, %v345_v56 }
 0x1f4   : > { %v1978_v52 = vadd.f32 %v1966_v1, %v1890_v16  ;;  %v1893_v36 = vadd.f32 %v1892_v30, %v1796_v19  ;;  %2879 = vpow2.f32 %v2611_v20  ;;  %v2614_v37 = vmul.f32 -1.442695, %v1980_v22  ;;  %v1894_v39 = vpop.f32.mrb[35].mxu1  ;;  %v1689_v43 = vpop.f32.mrb[4].mxu0  ;;  %v2458_v30 = vld [vmem:[%s4019_s2 + $0x68] sm:$0xff] }
 0x1f5   : > { %2881 = vpow2.f32 %v2613_v33  ;;  %v2716_v45 = vadd.f32 %v1689_v43, %v1288_v29  ;;  %v1691_v46 = vpop.f32.mrb[5].mxu0  ;;  %v2460_v33 = vld [vmem:[%s4019_s2 + $0x78] sm:$0xff]  ;;  %v2463_v39 = vld [vmem:[%s4019_s2 + $0x90] sm:$0xff] }
 0x1f6   : > { %v2612_v53 = vmul.f32 -1.442695, %v1978_v52  ;;  %v1981_v54 = vadd.f32 %v1969_v13, %v1893_v36  ;;  %2883 = vpow2.f32 %v2614_v37  ;;  %v2717_v59 = vadd.f32 %v1691_v46, %v1288_v29  ;;  %v1693_v60 = vpop.f32.mrb[6].mxu0  ;;  %v2459_v13 = vld [vmem:[%s4019_s2 + $0x70] sm:$0xff]  ;;  %v2462_v37 = vld [vmem:[%s4019_s2 + $0x88] sm:$0xff] }
 0x1f7   : > { %v1982_v1 = vadd.f32 %v2716_v45, %v1970_v34  ;;  %v2718_v2 = vadd.f32 %v1693_v60, %v1293_v50  ;;  %v1695_v4 = vpop.f32.mrb[7].mxu0  ;;  %v2062_v52 = vmul.f32 %v2459_v13, %v3576_v44  ;;  %v3651_v36 = vmul.f32 %v2457_v14, %v3546_v28  ;;  %v1303_v13 = vpop.permute.xlu0 %1302 }
 0x1f8   : > { %2885 = vpow2.f32 %v2612_v53  ;;  %v2615_v7 = vmul.f32 -1.442695, %v1981_v54  ;;  %v1983_v10 = vadd.f32 %v2717_v59, %v1971_v35  ;;  %v2719_v11 = vadd.f32 %v1695_v4, %v1293_v50  ;;  %v2466_v50 = vld [vmem:[%s4019_s2 + $0xa8] sm:$0xff]  ;;  %v1298_v54 = vpop.permute.xlu1 %1297 }
 0x1f9   : > { %v1897_v49 = vpop.f32.mrb[36].mxu1  ;;  %v2616_v16 = vmul.f32 -1.442695, %v1982_v1  ;;  %v1985_v19 = vadd.f32 %v2718_v2, %v1973_v47  ;;  %v3666_v59 = vmul.f32 %v2458_v30, %v3552_v31  ;;  %v3669_v60 = vmul.f32 %v2460_v33, %v3560_v23 }
 0x1fa   : > { %2887 = vpow2.f32 %v2615_v7  ;;  %v1898_v20 = vadd.f32 %v1897_v49, %v1801_v62  ;;  %v1899_v22 = vpop.f32.mrb[37].mxu1  ;;  %v2617_v26 = vmul.f32 -1.442695, %v1983_v10  ;;  %v1986_v29 = vadd.f32 %v2719_v11, %v1974_v48  ;;  %v2464_v48 = vld [vmem:[%s4019_s2 + $0x98] sm:$0xff]  ;;  %v2465_v10 = vld [vmem:[%s4019_s2 + $0xa0] sm:$0xff] }
 0x1fb   : > { %2889 = vpow2.f32 %v2616_v16  ;;  %v1900_v34 = vpop.f32.mrb[38].mxu1  ;;  %v2619_v35 = vmul.f32 -1.442695, %v1985_v19  ;;  %v3672_v62 = vmul.f32 %v2461_v58, %v3567_v38  ;;  %v2065_v4 = vmul.f32 %v2462_v37, %v3583_v51 }
 0x1fc   : > { %v1984_v41 = vadd.f32 %v1972_v63, %v1898_v20  ;;  %v1901_v43 = vadd.f32 %v1900_v34, %v1804_v55  ;;  %2891 = vpow2.f32 %v2617_v26  ;;  %v2620_v45 = vmul.f32 -1.442695, %v1986_v29  ;;  %v1902_v46 = vpop.f32.mrb[39].mxu1  ;;  %v1699_v47 = vpop.f32.mrb[8].mxu0  ;;  %v2468_v34 = vld [vmem:[%s4019_s2 + $0xb8] sm:$0xff] }
 0x1fd   : > { %v2878_v53 = vpop.eup %2877  ;;  %2893 = vpow2.f32 %v2619_v35  ;;  %v1701_v56 = vpop.f32.mrb[9].mxu0  ;;  %v3679_v16 = vmul.f32 %v2463_v39, %v3592_v5  ;;  %v3682_v55 = vmul.f32 %v2464_v48, %v3598_v8  ;;  %v1809_v26 = vadd.f32 %v3513_v61, %v1298_v54 }
 0x1fe   : > { %v2880_v63 = vpop.eup %2879  ;;  %v2024_v1 = vadd.f32 1.0, %v2878_v53  ;;  %v1987_v2 = vadd.f32 %v1975_v17, %v1901_v43  ;;  %2895 = vpow2.f32 %v2620_v45  ;;  %v1703_v7 = vpop.f32.mrb[10].mxu0  ;;  %v3685_v17 = vmul.f32 %v2466_v50, %v3606_v24 }
 0x1ff   : > { %v2882_v11 = vpop.eup %2881  ;;  %v2025_v14 = vadd.f32 1.0, %v2880_v63  ;;  %v1705_v49 = vpop.f32.mrb[11].mxu0  ;;  %v2618_v22 = vmul.f32 -1.442695, %v1984_v41  ;;  %v2720_v33 = vadd.f32 %v1699_v47, %v1298_v54  ;;  %v3689_v58 = vmul.f32 %v2465_v10, %v3620_v42 }
 0x200   : > { %v2884_v19 = vpop.eup %2883  ;;  %2897 = vrcp.f32 %v2024_v1  ;;  %v2027_v20 = vadd.f32 1.0, %v2882_v11  ;;  %v1308_v37 = vpop.permute.xlu1 %1307  ;;  %v2621_v39 = vmul.f32 -1.442695, %v1987_v2  ;;  %v1812_v41 = vadd.f32 %v3515_v0, %v1303_v13 }
 0x201   : > { %2899 = vrcp.f32 %v2025_v14  ;;  %v2028_v29 = vadd.f32 1.0, %v2884_v19  ;;  %v1905_v30 = vpop.f32.mrb[40].mxu1  ;;  %v2721_v48 = vadd.f32 %v1701_v56, %v1298_v54  ;;  %v2722_v47 = vadd.f32 %v1703_v7, %v1303_v13  ;;  %v3696_v19 = vpop.permute.xlu0 %1312 }
 0x202   : > { %v2886_v35 = vpop.eup %2885  ;;  %2901 = vrcp.f32 %v2027_v20  ;;  %v1906_v43 = vadd.f32 %v1905_v30, %v1809_v26  ;;  %v1907_v45 = vpop.f32.mrb[41].mxu1  ;;  %v2071_v11 = vmul.f32 %v2468_v34, %v3628_v57  ;;  %v2072_v0 = vadd.f32 %v2720_v33, %v3651_v36 }
 0x203   : > { %v2026_v61 = vadd.f32 1.0, %v2886_v35  ;;  %2903 = vrcp.f32 %v2028_v29  ;;  %v1908_v46 = vpop.f32.mrb[42].mxu1  ;;  %v1817_v20 = vadd.f32 %v3517_v3, %v1308_v37  ;;  %v2073_v34 = vadd.f32 %v2721_v48, %v3666_v59 }
 0x204   : > { %v2888_v50 = vpop.eup %2887  ;;  %2905 = vpow2.f32 %v2618_v22  ;;  %v2074_v53 = vadd.f32 %v2062_v52, %v1906_v43  ;;  %v1909_v63 = vadd.f32 %v1908_v46, %v1812_v41  ;;  %v1910_v1 = vpop.f32.mrb[43].mxu1  ;;  %v2723_v52 = vadd.f32 %v1705_v49, %v1303_v13 }
 0x205   : > { %v1709_v10 = vpop.f32.mrb[12].mxu0  ;;  %v2890_v14 = vpop.eup %2889  ;;  %2907 = vrcp.f32 %v2026_v61  ;;  %v2029_v2 = vadd.f32 1.0, %v2888_v50  ;;  %v2075_v35 = vadd.f32 %v2722_v47, %v3669_v60  ;;  %v1820_v3 = vadd.f32 %v3519_v6, %v3696_v19 }
 0x206   : > { %v1711_v26 = vpop.f32.mrb[13].mxu0  ;;  %v2892_v54 = vpop.eup %2891  ;;  %v2030_v56 = vadd.f32 1.0, %v2890_v14  ;;  %2909 = vpow2.f32 %v2621_v39  ;;  %v2077_v7 = vadd.f32 %v2065_v4, %v1909_v63  ;;  %v2624_v33 = vmul.f32 -1.442695, %v2074_v53 }
 0x207   : > { %v1713_v22 = vpop.f32.mrb[14].mxu0  ;;  %v2894_v29 = vpop.eup %2893  ;;  %2911 = vrcp.f32 %v2029_v2  ;;  %v2031_v30 = vadd.f32 1.0, %v2892_v54  ;;  %v2622_v4 = vmul.f32 -1.442695, %v2072_v0  ;;  %v2724_v49 = vadd.f32 %v1709_v10, %v1308_v37 }
 0x208   : > { %v1715_v43 = vpop.f32.mrb[15].mxu0  ;;  %v2896_v45 = vpop.eup %2895  ;;  %2913 = vrcp.f32 %v2030_v56  ;;  %v2033_v36 = vadd.f32 1.0, %v2894_v29  ;;  %v2627_v61 = vmul.f32 -1.442695, %v2077_v7  ;;  %v2076_v59 = vadd.f32 %v2723_v52, %v3672_v62  ;;  %v2467_v62 = vld [vmem:[%s4019_s2 + $0xb0] sm:$0xff] }
 0x209   : > { %2915 = vrcp.f32 %v2031_v30  ;;  %v2034_v39 = vadd.f32 1.0, %v2896_v45  ;;  %v1913_v13 = vpop.f32.mrb[44].mxu1  ;;  %v2623_v47 = vmul.f32 -1.442695, %v2073_v34  ;;  %v2625_v50 = vmul.f32 -1.442695, %v2075_v35  ;;  %v3720_v54 = vpop.permute.xlu1 %1317 }
 0x20a   : > { %v3704_v41 = vpop.eup %2897  ;;  %2917 = vrcp.f32 %v2033_v36  ;;  %v1914_v60 = vadd.f32 %v1913_v13, %v1817_v20  ;;  %v1915_v46 = vpop.f32.mrb[45].mxu1  ;;  %v2725_v6 = vadd.f32 %v1711_v26, %v1308_v37  ;;  %v2726_v14 = vadd.f32 %v1713_v22, %v3696_v19 }
 0x20b   : > { %v3707_v48 = vpop.eup %2899  ;;  %2919 = vrcp.f32 %v2034_v39  ;;  %v1916_v53 = vpop.f32.mrb[46].mxu1  ;;  %v2078_v37 = vadd.f32 %v2724_v49, %v3679_v16  ;;  %v2626_v7 = vmul.f32 -1.442695, %v2076_v59  ;;  %v2070_v35 = vmul.f32 %v2467_v62, %v3612_v27 }
 0x20c   : > { %v3709_v63 = vpop.eup %2901  ;;  %2921 = vpow2.f32 %v2624_v33  ;;  %v2080_v1 = vadd.f32 %v3689_v58, %v1914_v60  ;;  %v1917_v10 = vadd.f32 %v1916_v53, %v1820_v3  ;;  %v1918_v2 = vpop.f32.mrb[47].mxu1  ;;  %v2079_v34 = vadd.f32 %v2725_v6, %v3682_v55 }
 0x20d   : > { %v3716_v0 = vpop.f32.mrb[16].mxu0  ;;  %v3718_v20 = vpop.eup %2903  ;;  %2923 = vpow2.f32 %v2622_v4  ;;  %v2081_v33 = vadd.f32 %v2726_v14, %v3685_v17  ;;  %v2628_v4 = vmul.f32 -1.442695, %v2078_v37  ;;  %v2727_v59 = vadd.f32 %v1715_v43, %v3696_v19 }
 0x20e   : > { %v3723_v26 = vpop.f32.mrb[17].mxu0  ;;  %v2906_v58 = vpop.eup %2905  ;;  %2925 = vpow2.f32 %v2627_v61  ;;  %v2083_v52 = vadd.f32 %v2071_v11, %v1917_v10  ;;  %v2630_v36 = vmul.f32 -1.442695, %v2080_v1  ;;  %v1825_v11 = vadd.f32 %v3521_v9, %v3720_v54 }
 0x20f   : > { %v3725_v56 = vpop.permute.xlu0 %1322  ;;  %v3727_v22 = vpop.f32.mrb[18].mxu0  ;;  %v2032_v30 = vadd.f32 1.0, %v2906_v58  ;;  %2927 = vpow2.f32 %v2623_v47  ;;  %v2629_v9 = vmul.f32 -1.442695, %v2079_v34  ;;  %v2631_v53 = vmul.f32 -1.442695, %v2081_v33 }
 0x210   : > { %v3729_v29 = vpop.eup %2907  ;;  %v3733_v45 = vpop.f32.mrb[19].mxu0  ;;  %2929 = vpow2.f32 %v2625_v50  ;;  %v1828_v55 = vadd.f32 %v3523_v12, %v3725_v56  ;;  %v2633_v61 = vmul.f32 -1.442695, %v2083_v52  ;;  %v2082_v2 = vadd.f32 %v2727_v59, %v2070_v35 }
 0x211   : > { %v2910_v16 = vpop.eup %2909  ;;  %2931 = vrcp.f32 %v2032_v30  ;;  %v1921_v13 = vpop.f32.mrb[48].mxu1 }
 0x212   : > { %v3738_v3 = vpop.eup %2911  ;;  %v2035_v39 = vadd.f32 1.0, %v2910_v16  ;;  %2933 = vpow2.f32 %v2626_v7  ;;  %v3745_v60 = vadd.f32 %v1921_v13, %v1825_v11  ;;  %v1923_v17 = vpop.f32.mrb[49].mxu1  ;;  %v2632_v13 = vmul.f32 -1.442695, %v2082_v2 }
 0x213   : > { %v3742_v49 = vpop.eup %2913  ;;  %v1924_v47 = vpop.f32.mrb[50].mxu1 }
 0x214   : > { %v3747_v46 = vpop.eup %2915  ;;  %2935 = vrcp.f32 %v2035_v39  ;;  %v3751_v6 = vadd.f32 %v1924_v47, %v1828_v55  ;;  %v1926_v12 = vpop.f32.mrb[51].mxu1 }
 0x215   : > { %v3749_v50 = vpop.eup %2917  ;;  %2937 = vpow2.f32 %v2630_v36  ;;  %v3753_v1 = vpop.f32.mrb[20].mxu0 }
 0x216   : > { %4024 = vst [vmem:[#allocation3_spill] sm:$0xff] %v3749_v50  ;;  %v3755_v10 = vpop.eup %2919  ;;  %v3757_v19 = vpop.permute.xlu1 %1327  ;;  %2939 = vpow2.f32 %v2628_v4 }
 0x217   : > { %4025 = vst [vmem:[#allocation4_spill] sm:$0xff] %v3755_v10  ;;  %v3759_v43 = vpop.f32.mrb[21].mxu0  ;;  %v2922_v14 = vpop.eup %2921  ;;  %2941 = vpow2.f32 %v2633_v61  ;;  %v1833_v16 = vadd.f32 %v3525_v15, %v3757_v19 }
 0x218   : > { %v3761_v62 = vpop.permute.xlu0 %1332  ;;  %v3763_v37 = vpop.f32.mrb[22].mxu0  ;;  %v2122_v7 = vadd.f32 1.0, %v2922_v14  ;;  %2943 = vpow2.f32 %v2629_v9 }
 0x219   : > { %v2924_v58 = vpop.eup %2923  ;;  %v3765_v52 = vpop.f32.mrb[23].mxu0  ;;  %2945 = vpow2.f32 %v2631_v53  ;;  %v1836_v35 = vadd.f32 %v3527_v18, %v3761_v62 }
 0x21a   : > { %v2926_v30 = vpop.eup %2925  ;;  %v2120_v34 = vadd.f32 1.0, %v2924_v58  ;;  %2947 = vrcp.f32 %v2122_v7  ;;  %v1929_v11 = vpop.f32.mrb[52].mxu1 }
 0x21b   : > { %v2928_v36 = vpop.eup %2927  ;;  %v2125_v33 = vadd.f32 1.0, %v2926_v30  ;;  %v3771_v55 = vadd.f32 %v1929_v11, %v1833_v16  ;;  %v1931_v61 = vpop.f32.mrb[53].mxu1 }
 0x21c   : > { %v2930_v39 = vpop.eup %2929  ;;  %2949 = vrcp.f32 %v2120_v34  ;;  %v2121_v4 = vadd.f32 1.0, %v2928_v36  ;;  %v1932_v9 = vpop.f32.mrb[54].mxu1 }
 0x21d   : > { %v3773_v59 = vpop.eup %2931  ;;  %2951 = vrcp.f32 %v2125_v33  ;;  %v2123_v17 = vadd.f32 1.0, %v2930_v39  ;;  %v3775_v47 = vadd.f32 %v1932_v9, %v1836_v35  ;;  %v1934_v53 = vpop.f32.mrb[55].mxu1 }
 0x21e   : > { %v2934_v15 = vpop.eup %2933  ;;  %2953 = vrcp.f32 %v2121_v4  ;;  %v3777_v12 = vpop.f32.mrb[24].mxu0  ;;  %v2728_v53 = vadd.f32 %v3716_v0, %v3720_v54  ;;  %v2730_v0 = vadd.f32 %v3727_v22, %v3725_v56 }
 0x21f   : > { %v3779_v18 = vpop.eup %2935  ;;  %v3781_v14 = vpop.permute.xlu1 %1337  ;;  %2955 = vrcp.f32 %v2123_v17  ;;  %v2124_v2 = vadd.f32 1.0, %v2934_v15 }
 0x220   : > { %v3783_v58 = vpop.f32.mrb[25].mxu0  ;;  %v2938_v7 = vpop.eup %2937  ;;  %2957 = vpow2.f32 %v2632_v13  ;;  %v1841_v39 = vadd.f32 %v3532_v21, %v3781_v14 }
 0x221   : > { %v3785_v30 = vpop.permute.xlu0 %1342  ;;  %v3787_v34 = vpop.f32.mrb[26].mxu0  ;;  %2959 = vrcp.f32 %v2124_v2  ;;  %v2128_v36 = vadd.f32 1.0, %v2938_v7 }
 0x222   : > { %v2940_v16 = vpop.eup %2939  ;;  %v3789_v33 = vpop.f32.mrb[27].mxu0  ;;  %2961 = vtanh.f32 %v3745_v60  ;;  %v1844_v13 = vadd.f32 %v3534_v25, %v3785_v30 }
 0x223   : > { %v2942_v11 = vpop.eup %2941  ;;  %v2126_v35 = vadd.f32 1.0, %v2940_v16  ;;  %2963 = vrcp.f32 %v2128_v36  ;;  %v1937_v17 = vpop.f32.mrb[56].mxu1  ;;  %v2729_v36 = vadd.f32 %v3723_v26, %v3720_v54 }
 0x224   : > { %v2944_v4 = vpop.eup %2943  ;;  %v2131_v61 = vadd.f32 1.0, %v2942_v11  ;;  %v3798_v2 = vadd.f32 %v1937_v17, %v1841_v39  ;;  %v1939_v7 = vpop.f32.mrb[57].mxu1 }
 0x225   : > { %v2946_v9 = vpop.eup %2945  ;;  %2965 = vrcp.f32 %v2126_v35  ;;  %v2127_v15 = vadd.f32 1.0, %v2944_v4  ;;  %v1940_v21 = vpop.f32.mrb[58].mxu1 }
 0x226   : > { %v2948_v60 = vpop.eup %2947  ;;  %2967 = vrcp.f32 %v2131_v61  ;;  %v2129_v16 = vadd.f32 1.0, %v2946_v9  ;;  %v3802_v11 = vadd.f32 %v1940_v21, %v1844_v13  ;;  %v1942_v25 = vpop.f32.mrb[59].mxu1  ;;  %v2731_v61 = vadd.f32 %v3733_v45, %v3725_v56 }
 0x227   : > { %v2950_v10 = vpop.eup %2949  ;;  %2969 = vrcp.f32 %v2127_v15  ;;  %v1749_v35 = vpop.f32.mrb[28].mxu0 }
 0x228   : > { %v2952_v4 = vpop.eup %2951  ;;  %v1348_v50 = vpop.permute.xlu1 %1347  ;;  %2971 = vrcp.f32 %v2129_v16 }
 0x229   : > { %v1751_v39 = vpop.f32.mrb[29].mxu0  ;;  %v2954_v17 = vpop.eup %2953  ;;  %2973 = vtanh.f32 %v2728_v53  ;;  %v1849_v7 = vadd.f32 %v3554_v32, %v1348_v50  ;;  %v2158_v53 = vmul.f32 %v2948_v60, %v3576_v44  ;;  %v2733_v44 = vadd.f32 %v3759_v43, %v3757_v19 }
 0x22a   : > { %v3808_v9 = vpop.f32.mrb[30].mxu0  ;;  %v2956_v15 = vpop.eup %2955  ;;  %2975 = vtanh.f32 %v3751_v6  ;;  %v2732_v6 = vadd.f32 %v3753_v1, %v3757_v19  ;;  %v2471_v1 = vld [vmem:[%s4019_s2 + $0xd0] sm:$0xff]  ;;  %v3840_v19 = vadd.f32 %v3783_v58, %v3781_v14  ;;  %v2161_v58 = vmul.f32 %v2952_v4, %v3583_v51  ;;  %v2469_v51 = vld [vmem:[%s4019_s2 + $0xc0] sm:$0xff] }
 0x22b   : > { %4026 = vst [vmem:[#allocation5_spill] sm:$0xff] %v3808_v9  ;;  %v3810_v54 = vpop.permute.xlu0 %1352  ;;  %v3813_v26 = vpop.f32.mrb[31].mxu0  ;;  %2977 = vtanh.f32 %v2729_v36 }
 0x22c   : > { %4027 = vst [vmem:[#allocation6_spill] sm:$0xff] %v3813_v26  ;;  %v2958_v13 = vpop.eup %2957  ;;  %2979 = vtanh.f32 %v2730_v0  ;;  %v1945_v21 = vpop.f32.mrb[60].mxu1  ;;  %v1852_v45 = vadd.f32 %v3569_v40, %v3810_v54  ;;  %v2734_v40 = vadd.f32 %v3763_v37, %v3761_v62  ;;  %v2156_v37 = vmul.f32 %v2950_v10, %v3546_v28 }
 0x22d   : > { %v2960_v22 = vpop.eup %2959  ;;  %v2130_v16 = vadd.f32 1.0, %v2958_v13  ;;  %2981 = vtanh.f32 %v2731_v61  ;;  %v3821_v25 = vadd.f32 %v1945_v21, %v1849_v7  ;;  %v1947_v26 = vpop.f32.mrb[61].mxu1  ;;  %v3861_v7 = vadd.f32 %v1749_v35, %v1348_v50 }
 0x22e   : > { %v2962_v56 = vpop.eup %2961  ;;  %v1948_v36 = vpop.f32.mrb[62].mxu1  ;;  %v2157_v28 = vmul.f32 %v2954_v17, %v3552_v31  ;;  %v2159_v10 = vmul.f32 %v2956_v15, %v3560_v23 }
 0x22f   : > { %v2964_v9 = vpop.eup %2963  ;;  %2983 = vrcp.f32 %v2130_v16  ;;  %v2182_v32 = vmul.f32 %v2962_v56, %v3729_v29  ;;  %v3832_v60 = vadd.f32 %v1948_v36, %v1852_v45  ;;  %v1950_v61 = vpop.f32.mrb[63].mxu1  ;;  %v2735_v29 = vadd.f32 %v3765_v52, %v3761_v62 }
 0x230   : > { %v2966_v0 = vpop.eup %2965  ;;  %2985 = vtanh.f32 %v3771_v55  ;;  %v2736_v55 = vadd.f32 %v3777_v12, %v3781_v14  ;;  %v3851_v62 = vadd.f32 %v3787_v34, %v3785_v30  ;;  %v3855_v52 = vadd.f32 %v3789_v33, %v3785_v30 }
 0x231   : > { %v2968_v26 = vpop.eup %2967  ;;  %v2194_v13 = vadd.f32 %v2182_v32, %v2158_v53  ;;  %2987 = vtanh.f32 %v2732_v6  ;;  %v3865_v34 = vadd.f32 %v1751_v39, %v1348_v50  ;;  %v2160_v53 = vmul.f32 %v2960_v22, %v3567_v38  ;;  %v2474_v38 = vld [vmem:[%s4019_s2 + $0xe8] sm:$0xff]  ;;  %v2472_v22 = vld [vmem:[%s4019_s2 + $0xd8] sm:$0xff] }
 0x232   : > { %v2970_v43 = vpop.eup %2969  ;;  %2989 = vtanh.f32 %v3775_v47  ;;  %v2164_v23 = vmul.f32 %v2964_v9, %v3620_v42  ;;  %v3876_v50 = vmul.f32 %v2966_v0, %v3592_v5  ;;  %v3883_v39 = vmul.f32 %v2968_v26, %v3628_v57  ;;  %v2470_v5 = vld [vmem:[%s4019_s2 + $0xc8] sm:$0xff] }
 0x233   : > { %v2972_v12 = vpop.eup %2971  ;;  %v2206_v14 = vmul.f32 %v2471_v1, %v2194_v13  ;;  %2338 = vst.msk [vmem:[%s3846_s16 + $0x10] sm:$0xff] %vm434_vm0, %v2194_v13  ;;  %2991 = vtanh.f32 %v2733_v44  ;;  %v3890_v9 = vmul.f32 %v2970_v43, %v3598_v8 }
 0x234   : > { %v2974_v16 = vpop.eup %2973  ;;  %2993 = vtanh.f32 %v2734_v40  ;;  %v3903_v32 = vmul.f32 %v2972_v12, %v3606_v24 }
 0x235   : > { %v2976_v30 = vpop.eup %2975  ;;  %v2218_v33 = vadd.f32 %v2206_v14, %v3798_v2  ;;  %v2180_v47 = vmul.f32 %v2974_v16, %v3704_v41  ;;  %2995 = vtanh.f32 %v2735_v29 }
 0x236   : > { %v2978_v21 = vpop.eup %2977  ;;  %v2185_v31 = vmul.f32 %v2976_v30, %v3738_v3  ;;  %2997 = vtanh.f32 %v2194_v13  ;;  %v2475_v30 = vld [vmem:[%s4019_s2 + $0xf0] sm:$0xff] }
 0x237   : > { %v2980_v35 = vpop.eup %2979  ;;  %v2636_v2 = vmul.f32 -1.442695, %v2218_v33  ;;  %v2192_v4 = vadd.f32 %v2180_v47, %v2156_v37  ;;  %v2181_v41 = vmul.f32 %v2978_v21, %v3707_v48 }
 0x238   : > { %v2982_v17 = vpop.eup %2981  ;;  %v2197_v42 = vadd.f32 %v2185_v31, %v2161_v58  ;;  %v2183_v3 = vmul.f32 %v2980_v35, %v3709_v63  ;;  %v2473_v63 = vld [vmem:[%s4019_s2 + $0xe0] sm:$0xff]  ;;  %v4028_v31 = vld [vmem:[#allocation3_spill] sm:$0xff] }
 0x239   : > { %v2984_v15 = vpop.eup %2983  ;;  %2999 = vpow2.f32 %v2636_v2  ;;  %v2204_v48 = vmul.f32 %v2469_v51, %v2192_v4  ;;  %2336 = vst [vmem:[%s3846_s16] sm:$0xff] %v2192_v4  ;;  %v2193_v57 = vadd.f32 %v2181_v41, %v2157_v28  ;;  %v2184_v56 = vmul.f32 %v2982_v17, %v3718_v20  ;;  %v4029_v2 = vld [vmem:[#allocation4_spill] sm:$0xff]  ;;  %v2478_v17 = vld [vmem:[%s4019_s2 + $0x108] sm:$0xff] }
 0x23a   : > { %v2986_v45 = vpop.eup %2985  ;;  %3001 = vtanh.f32 %v2192_v4  ;;  %v2209_v6 = vmul.f32 %v2474_v38, %v2197_v42  ;;  %2341 = vst.msk [vmem:[%s3846_s16 + $0x28] sm:$0xff] %vm434_vm0, %v2197_v42  ;;  %v2195_v8 = vadd.f32 %v2183_v3, %v2159_v10  ;;  %v3907_v20 = vmul.f32 %v2984_v15, %v3612_v27  ;;  %v2477_v27 = vld [vmem:[%s4019_s2 + $0x100] sm:$0xff] }
 0x23b   : > { %v2216_v36 = vadd.f32 %v2736_v55, %v2204_v48  ;;  %v2205_v0 = vmul.f32 %v2470_v5, %v2193_v57  ;;  %2337 = vst [vmem:[%s3846_s16 + $0x8] sm:$0xff] %v2193_v57  ;;  %v2196_v44 = vadd.f32 %v2184_v56, %v2160_v53  ;;  %v2988_v40 = vpop.eup %2987  ;;  %3003 = vtanh.f32 %v2197_v42 }
 0x23c   : > { %v2221_v1 = vadd.f32 %v2209_v6, %v3802_v11  ;;  %v2207_v61 = vmul.f32 %v2472_v22, %v2195_v8  ;;  %2339 = vst [vmem:[%s3846_s16 + $0x18] sm:$0xff] %v2195_v8  ;;  %v2188_v26 = vmul.f32 %v2986_v45, %v3773_v59  ;;  %v2990_v29 = vpop.eup %2989  ;;  %3005 = vtanh.f32 %v2193_v57  ;;  %v4030_v57 = vld [vmem:[#allocation5_spill] sm:$0xff] }
 0x23d   : > { %v2634_v13 = vmul.f32 -1.442695, %v2216_v36  ;;  %v2217_v24 = vadd.f32 %v3840_v19, %v2205_v0  ;;  %v2208_v55 = vmul.f32 %v2473_v63, %v2196_v44  ;;  %2340 = vst [vmem:[%s3846_s16 + $0x20] sm:$0xff] %v2196_v44  ;;  %v2992_v43 = vpop.eup %2991  ;;  %3007 = vtanh.f32 %v2195_v8 }
 0x23e   : > { %v2639_v37 = vmul.f32 -1.442695, %v2221_v1  ;;  %v2219_v11 = vadd.f32 %v3851_v62, %v2207_v61  ;;  %v2200_v12 = vadd.f32 %v2188_v26, %v2164_v23  ;;  %v2994_v14 = vpop.eup %2993  ;;  %v2186_v19 = vmul.f32 %v2988_v40, %v3742_v49  ;;  %v2480_v49 = vld [vmem:[%s4019_s2 + $0x118] sm:$0xff] }
 0x23f   : > { %3009 = vpow2.f32 %v2634_v13  ;;  %v2635_v59 = vmul.f32 -1.442695, %v2217_v24  ;;  %v2220_v58 = vadd.f32 %v3855_v52, %v2208_v55  ;;  %v2996_v16 = vpop.eup %2995  ;;  %v2191_v62 = vmul.f32 %v2990_v29, %v3779_v18  ;;  %v2476_v18 = vld [vmem:[%s4019_s2 + $0xf8] sm:$0xff] }
 0x240   : > { %3011 = vpow2.f32 %v2639_v37  ;;  %v2637_v28 = vmul.f32 -1.442695, %v2219_v11  ;;  %v2212_v10 = vmul.f32 %v2477_v27, %v2200_v12  ;;  %2344 = vst.msk [vmem:[%s3846_s16 + $0x40] sm:$0xff] %vm434_vm0, %v2200_v12  ;;  %v2198_v47 = vadd.f32 %v2186_v19, %v3876_v50  ;;  %v3931_v53 = vpop.eup %2997 }
 0x241   : > { %3013 = vpow2.f32 %v2635_v59  ;;  %v2638_v33 = vmul.f32 -1.442695, %v2220_v58  ;;  %v2187_v52 = vmul.f32 %v2992_v43, %v3747_v46  ;;  %v3935_v51 = vadd.f32 %v2191_v62, %v3883_v39 }
 0x242   : > { %3015 = vpow2.f32 %v2637_v28  ;;  %v2224_v21 = vadd.f32 %v2212_v10, %v3821_v25  ;;  %v2189_v23 = vmul.f32 %v2994_v14, %v4028_v31  ;;  %v2210_v35 = vmul.f32 %v2475_v30, %v2198_v47  ;;  %2342 = vst [vmem:[%s3846_s16 + $0x30] sm:$0xff] %v2198_v47 }
 0x243   : > { %v3000_v50 = vpop.eup %2999  ;;  %3017 = vpow2.f32 %v2638_v33  ;;  %v3943_v46 = vadd.f32 %v2187_v52, %v3890_v9  ;;  %v2190_v4 = vmul.f32 %v2996_v16, %v4029_v2  ;;  %v2215_v39 = vmul.f32 %v2480_v49, %v3935_v51  ;;  %2347 = vst.msk [vmem:[%s3846_s16 + $0x58] sm:$0xff] %vm434_vm0, %v3935_v51  ;;  %v2479_v9 = vld [vmem:[%s4019_s2 + $0x110] sm:$0xff] }
 0x244   : > { %v3946_v25 = vpop.eup %3001  ;;  %v2266_v38 = vadd.f32 1.0, %v3000_v50  ;;  %3019 = vtanh.f32 %v2196_v44  ;;  %v2642_v41 = vmul.f32 -1.442695, %v2224_v21  ;;  %v2222_v42 = vadd.f32 %v3861_v7, %v2210_v35 }
 0x245   : > { %3021 = vtanh.f32 %v2200_v12  ;;  %v2211_v5 = vmul.f32 %v2476_v18, %v3943_v46  ;;  %2343 = vst [vmem:[%s3846_s16 + $0x38] sm:$0xff] %v3943_v46  ;;  %v3960_v3 = vadd.f32 %v2189_v23, %v3903_v32  ;;  %v3965_v15 = vpop.eup %3003  ;;  %v2227_v48 = vadd.f32 %v2215_v39, %v3832_v60  ;;  %v4031_v60 = vld [vmem:[#allocation6_spill] sm:$0xff] }
 0x246   : > { %3023 = vrcp.f32 %v2266_v38  ;;  %v2742_v7 = vadd.f32 %v4030_v57, %v3810_v54  ;;  %v3971_v22 = vadd.f32 %v2190_v4, %v3907_v20  ;;  %v3973_v56 = vpop.eup %3005  ;;  %v2640_v45 = vmul.f32 -1.442695, %v2222_v42 }
 0x247   : > { %3025 = vpow2.f32 %v2642_v41  ;;  %v2223_v6 = vadd.f32 %v3865_v34, %v2211_v5  ;;  %v2213_v8 = vmul.f32 %v2478_v17, %v3960_v3  ;;  %2345 = vst [vmem:[%s3846_s16 + $0x48] sm:$0xff] %v3960_v3  ;;  %v3008_v63 = vpop.eup %3007  ;;  %v2645_v32 = vmul.f32 -1.442695, %v2227_v48 }
 0x248   : > { %3027 = vtanh.f32 %v2198_v47  ;;  %v2743_v36 = vadd.f32 %v4031_v60, %v3810_v54  ;;  %v2214_v0 = vmul.f32 %v2479_v9, %v3971_v22  ;;  %2346 = vst [vmem:[%s3846_s16 + $0x50] sm:$0xff] %v3971_v22 }
 0x249   : > { %v3010_v44 = vpop.eup %3009  ;;  %3029 = vpow2.f32 %v2640_v45  ;;  %v2641_v20 = vmul.f32 -1.442695, %v2223_v6  ;;  %v2225_v40 = vadd.f32 %v2742_v7, %v2213_v8 }
 0x24a   : > { %v3012_v1 = vpop.eup %3011  ;;  %v2264_v34 = vadd.f32 1.0, %v3010_v44  ;;  %3031 = vpow2.f32 %v2645_v32  ;;  %v2226_v61 = vadd.f32 %v2743_v36, %v2214_v0 }
 0x24b   : > { %v3014_v26 = vpop.eup %3013  ;;  %v2269_v29 = vadd.f32 1.0, %v3012_v1  ;;  %3033 = vpow2.f32 %v2641_v20  ;;  %v2643_v37 = vmul.f32 -1.442695, %v2225_v40 }
 0x24c   : > { %v3016_v13 = vpop.eup %3015  ;;  %3035 = vrcp.f32 %v2264_v34  ;;  %v2265_v24 = vadd.f32 1.0, %v3014_v26  ;;  %v2644_v58 = vmul.f32 -1.442695, %v2226_v61 }
 0x24d   : > { %v3018_v55 = vpop.eup %3017  ;;  %3037 = vrcp.f32 %v2269_v29  ;;  %v2267_v54 = vadd.f32 1.0, %v3016_v13 }
 0x24e   : > { %v3020_v27 = vpop.eup %3019  ;;  %3039 = vrcp.f32 %v2265_v24  ;;  %v2268_v43 = vadd.f32 1.0, %v3018_v55 }
 0x24f   : > { %v3022_v11 = vpop.eup %3021  ;;  %3041 = vrcp.f32 %v2267_v54 }
 0x250   : > { %v3024_v12 = vpop.eup %3023  ;;  %3043 = vrcp.f32 %v2268_v43 }
 0x251   : > { %v3026_v14 = vpop.eup %3025  ;;  %v2314_v59 = vmul.f32 %v3024_v12, %v3931_v53  ;;  %3045 = vtanh.f32 %v3935_v51 }
 0x252   : > { %v3028_v19 = vpop.eup %3027  ;;  %v2272_v16 = vadd.f32 1.0, %v3026_v14  ;;  %3047 = vpow2.f32 %v2643_v37 }
 0x253   : > { %v3030_v28 = vpop.eup %3029  ;;  %2326 = vst.msk [vmem:[%s3990_s19 + $0x10] sm:$0xff] %vm434_vm0, %v2314_v59  ;;  %3049 = vtanh.f32 %v3943_v46 }
 0x254   : > { %v3032_v10 = vpop.eup %3031  ;;  %3051 = vrcp.f32 %v2272_v16  ;;  %v2270_v30 = vadd.f32 1.0, %v3030_v28 }
 0x255   : > { %v3034_v62 = vpop.eup %3033  ;;  %v2275_v33 = vadd.f32 1.0, %v3032_v10  ;;  %3053 = vpow2.f32 %v2644_v58 }
 0x256   : > { %v3036_v47 = vpop.eup %3035  ;;  %3055 = vrcp.f32 %v2270_v30  ;;  %v2271_v49 = vadd.f32 1.0, %v3034_v62 }
 0x257   : > { %v3038_v52 = vpop.eup %3037  ;;  %v2312_v53 = vmul.f32 %v3036_v47, %v3946_v25  ;;  %3057 = vrcp.f32 %v2275_v33 }
 0x258   : > { %v3040_v21 = vpop.eup %3039  ;;  %v2317_v51 = vmul.f32 %v3038_v52, %v3965_v15  ;;  %3059 = vrcp.f32 %v2271_v49 }
 0x259   : > { %v3042_v18 = vpop.eup %3041  ;;  %2324 = vst [vmem:[%s3990_s19] sm:$0xff] %v2312_v53  ;;  %v2313_v31 = vmul.f32 %v3040_v21, %v3973_v56  ;;  %3061 = vtanh.f32 %v3960_v3 }
 0x25a   : > { %v3044_v23 = vpop.eup %3043  ;;  %2329 = vst.msk [vmem:[%s3990_s19 + $0x28] sm:$0xff] %vm434_vm0, %v2317_v51  ;;  %v2315_v50 = vmul.f32 %v3042_v18, %v3008_v63 }
 0x25b   : > { %v3046_v35 = vpop.eup %3045  ;;  %2325 = vst [vmem:[%s3990_s19 + $0x8] sm:$0xff] %v2313_v31  ;;  %v2316_v46 = vmul.f32 %v3044_v23, %v3020_v27 }
 0x25c   : > { %v3048_v2 = vpop.eup %3047  ;;  %2327 = vst [vmem:[%s3990_s19 + $0x18] sm:$0xff] %v2315_v50 }
 0x25d   : > { %v3050_v4 = vpop.eup %3049  ;;  %2328 = vst [vmem:[%s3990_s19 + $0x20] sm:$0xff] %v2316_v46  ;;  %v2273_v25 = vadd.f32 1.0, %v3048_v2 }
 0x25e   : > { %v3052_v38 = vpop.eup %3051 }
 0x25f   : > { %v3054_v41 = vpop.eup %3053  ;;  %v2320_v39 = vmul.f32 %v3052_v38, %v3022_v11  ;;  %3063 = vrcp.f32 %v2273_v25 }
 0x260   : > { %v3056_v17 = vpop.eup %3055  ;;  %v2274_v42 = vadd.f32 1.0, %v3054_v41  ;;  %3065 = vtanh.f32 %v3971_v22 }
 0x261   : > { %v3058_v5 = vpop.eup %3057  ;;  %2332 = vst.msk [vmem:[%s3990_s19 + $0x40] sm:$0xff] %vm434_vm0, %v2320_v39  ;;  %v2318_v9 = vmul.f32 %v3056_v17, %v3028_v19 }
 0x262   : > { %v3060_v15 = vpop.eup %3059  ;;  %v2323_v48 = vmul.f32 %v3058_v5, %v3046_v35  ;;  %3067 = vrcp.f32 %v2274_v42 }
 0x263   : > { %2330 = vst [vmem:[%s3990_s19 + $0x30] sm:$0xff] %v2318_v9  ;;  %v2319_v57 = vmul.f32 %v3060_v15, %v3050_v4  ;;  %v3062_v3 = vpop.eup %3061 }
 0x264   : > { %2335 = vst.msk [vmem:[%s3990_s19 + $0x58] sm:$0xff] %vm434_vm0, %v2323_v48 }
 0x265   : > { %2331 = vst [vmem:[%s3990_s19 + $0x38] sm:$0xff] %v2319_v57 }
 0x269   : > { %v3064_v7 = vpop.eup %3063 }
 0x26a   : > { %v2321_v56 = vmul.f32 %v3064_v7, %v3062_v3  ;;  %v3066_v45 = vpop.eup %3065 }
 0x26c   : > { %v3068_v6 = vpop.eup %3067  ;;  %2333 = vst [vmem:[%s3990_s19 + $0x48] sm:$0xff] %v2321_v56 }
 0x26d   : > { %v2322_v8 = vmul.f32 %v3068_v6, %v3066_v45 }
 0x26f   : > { %2334 = vst [vmem:[%s3990_s19 + $0x50] sm:$0xff] %v2322_v8 }
 0x270 PF: > { %s17_s21 = sadd.s32 1, %s3075_s21  }
 0x271   : > { %p14_p4 = scmp.ge.s32.totalorder %s17_s21, 4  }
 0x273   :  { %16 = sbr.rel (!%p14_p4) target bundleno = 1 (0x1), region = 87 }

</bundles_post_ra>
